<compile_context>
chip_gen: v7x
topology: tpu7x:2x2x1
jax: 0.10.0
libtpu: 0.0.40
codegen_flags: <defaults>
</compile_context>

<pallas_src>
import functools

import jax
import jax.numpy as jnp
from jax.experimental import pallas as pl
from jax.experimental.pallas import tpu as pltpu  # noqa: F401  (compiler params, if ever needed)


def _apply_activation(t, name):
    if name == "relu":
        return jnp.maximum(t, 0.0)
    if name == "gelu":
        return jax.nn.gelu(t)
    if name == "tanh":
        return jnp.tanh(t)
    if name == "sigmoid":
        return jax.nn.sigmoid(t)
    raise ValueError(f"Unknown activation function {name}")


# ---------------------------------------------------------------------------
# Kernel: the whole TransformerEncoder (all layers, whole batch) in one step.
# ---------------------------------------------------------------------------
def fused_encoder_kernel(
    x_ref, mask_ref,
    wqkv_ref, wo_ref, w1_ref, w2_ref, vec_ref,
    out_ref, attnw_ref=None,
    *, num_layers, num_heads, batch_size, eps, compute_dtype, ff_activation,
):
    BS, D = x_ref.shape
    B = batch_size
    S = BS // B
    H = num_heads
    dh = D // H
    FF = w1_ref.shape[2]
    cd = compute_dtype

    x = x_ref[...].astype(jnp.float32)                       # (B*S, D) carried
    scale = jnp.float32(1.0) / jnp.sqrt(jnp.float32(dh))

    # Additive mask bias per (batch, head): (B*H, 1, S); computed once.
    neg_rows = mask_ref[...].astype(jnp.float32) * jnp.float32(-1e9)   # (B, S)
    neg_bias = jnp.stack(
        [neg_rows[b:b + 1] for b in range(B) for _ in range(H)])       # (B*H,1,S)

    def layer_norm(t, gamma, beta):
        mu = jnp.mean(t, axis=-1, keepdims=True)
        var = jnp.mean(jnp.square(t - mu), axis=-1, keepdims=True)
        return (t - mu) * jax.lax.rsqrt(var + eps) * gamma + beta

    for li in range(num_layers):            # static python loop (L is small)
        # packed bias / LayerNorm slab for this layer: (8, max_w)
        vec = vec_ref[li]
        bqkv = vec[0:1, 0:3 * D]
        bo = vec[1:2, 0:D]
        b1 = vec[2:3, 0:FF]
        b2 = vec[3:4, 0:D]
        g1, beta1 = vec[4:5, 0:D], vec[5:6, 0:D]
        g2, beta2 = vec[6:7, 0:D], vec[7:8, 0:D]

        # ---- fused QKV projection: single (B*S,D)@(D,3D) matmul ----------
        qkv = jnp.dot(x.astype(cd), wqkv_ref[li],
                      preferred_element_type=jnp.float32) + bqkv       # (B*S,3D)

        # split into per-(batch, head) tiles; columns are head-major [q|k|v]
        heads = jnp.stack(
            [qkv[b * S:(b + 1) * S, h * 3 * dh:(h + 1) * 3 * dh]
             for b in range(B) for h in range(H)])                     # (B*H,S,3dh)
        q = heads[..., 0:dh]
        k = heads[..., dh:2 * dh]
        v = heads[..., 2 * dh:3 * dh]

        # ---- scaled-dot-product attention batched over B*H heads ---------
        logits = jnp.einsum("hqd,hkd->hqk", q.astype(cd), k.astype(cd),
                            preferred_element_type=jnp.float32)
        logits = logits * scale + neg_bias                             # (B*H,S,S)
        m = jnp.max(logits, axis=-1, keepdims=True)
        e = jnp.exp(logits - m)
        w = e / jnp.sum(e, axis=-1, keepdims=True)    # exact softmax (user-visible)

        if attnw_ref is not None:
            # lane-dense store: one (S, B*H*S) slab per layer
            attnw_ref[li] = jnp.concatenate([w[i] for i in range(B * H)], axis=-1)

        ctx = jnp.einsum("hqk,hkd->hqd", w.astype(cd), v.astype(cd),
                         preferred_element_type=jnp.float32)           # (B*H,S,dh)

        # stitch heads back along lanes: (B*H, S, dh) -> (B*S, D), col = h*dh+d
        ctx_flat = jnp.concatenate(
            [jnp.concatenate([ctx[b * H + h] for h in range(H)], axis=-1)
             for b in range(B)], axis=0)                               # (B*S, D)

        # ---- fused output projection: single (B*S,D)@(D,D) matmul --------
        attn_out = jnp.dot(ctx_flat.astype(cd), wo_ref[li],
                           preferred_element_type=jnp.float32) + bo
        # TODO(synk): dropout_attn omitted (eval-mode identity).

        norm1 = layer_norm(attn_out + x, g1, beta1)

        # ---- feed-forward: Linear -> activation -> Linear -----------------
        h1 = jnp.dot(norm1.astype(cd), w1_ref[li],
                     preferred_element_type=jnp.float32) + b1
        h1 = _apply_activation(h1, ff_activation)
        ff = jnp.dot(h1.astype(cd), w2_ref[li],
                     preferred_element_type=jnp.float32) + b2
        # TODO(synk): dropout_ff omitted (eval-mode identity).

        x = layer_norm(ff + norm1, g2, beta2)

    out_ref[...] = x.astype(out_ref.dtype)


# ---------------------------------------------------------------------------
# Host-side parameter packing: 16*L tensors -> 5 stacked arrays.
# ---------------------------------------------------------------------------
def pack_params(all_layer_params, num_heads, compute_dtype):
    D = all_layer_params[0]["wq"].shape[0]
    FF = all_layer_params[0]["w1"].shape[1]
    H = num_heads
    dh = D // H
    max_w = max(3 * D, FF, D)

    def pad_row(v):
        return jnp.pad(v, ((0, 0), (0, max_w - v.shape[1])))

    wqkv_l, wo_l, w1_l, w2_l, vec_l = [], [], [], [], []
    for p in all_layer_params:
        # head-major packed QKV weight: columns = [head][q|k|v][dh]
        wqkv = jnp.concatenate(
            [p["wq"].reshape(D, H, dh), p["wk"].reshape(D, H, dh),
             p["wv"].reshape(D, H, dh)], axis=-1).reshape(D, 3 * D)
        bqkv = jnp.concatenate(
            [p["bq"].reshape(1, H, dh), p["bk"].reshape(1, H, dh),
             p["bv"].reshape(1, H, dh)], axis=-1).reshape(1, 3 * D)

        wqkv_l.append(wqkv.astype(compute_dtype))
        wo_l.append(p["wo"].astype(compute_dtype))
        w1_l.append(p["w1"].astype(compute_dtype))
        w2_l.append(p["w2"].astype(compute_dtype))
        # 8 small vectors packed into one (8, max_w) f32 slab
        vec_l.append(jnp.concatenate(
            [pad_row(bqkv), pad_row(p["bo"]), pad_row(p["b1"]), pad_row(p["b2"]),
             pad_row(p["g1"]), pad_row(p["beta1"]), pad_row(p["g2"]),
             pad_row(p["beta2"])], axis=0))

    return [jnp.stack(wqkv_l), jnp.stack(wo_l), jnp.stack(w1_l),
            jnp.stack(w2_l), jnp.stack(vec_l).astype(jnp.float32)]


# ---------------------------------------------------------------------------
# TransformerEncoder wrapper: one single-step pallas_call for the whole stack.
# ---------------------------------------------------------------------------
def transformer_encoder(x, padding_mask, all_layer_params, *, num_heads, eps,
                        compute_dtype=jnp.float32, ff_activation="relu",
                        return_attn_weights=True):
    B, S, D = x.shape
    L = len(all_layer_params)
    H = num_heads
    packed = pack_params(all_layer_params, num_heads, compute_dtype)

    kernel = functools.partial(
        fused_encoder_kernel, num_layers=L, num_heads=H, batch_size=B,
        eps=eps, compute_dtype=compute_dtype, ff_activation=ff_activation)

    x_flat = x.reshape(B * S, D)                              # free host reshape
    mask_rows = padding_mask.reshape(B, S).astype(jnp.float32)
    out_shape_x = jax.ShapeDtypeStruct((B * S, D), x.dtype)

    if return_attn_weights:
        out_shape = (out_shape_x,
                     jax.ShapeDtypeStruct((L, S, B * H * S), jnp.float32))
        out_flat, attnw_raw = pl.pallas_call(kernel, out_shape=out_shape)(
            x_flat, mask_rows, *packed)
        out = out_flat.reshape(B, S, D)
        # attnw_raw[l, q, b*H*S + h*S + k] -> (B, L, H, S, S)
        attnw = attnw_raw.reshape(L, S, B, H, S).transpose(2, 0, 3, 1, 4)
        attn_weights = {f"layer_{i + 1}": {"self_attn": attnw[:, i]}
                        for i in range(L)}
        return out, attn_weights
    else:
        out_flat = pl.pallas_call(kernel, out_shape=out_shape_x)(
            x_flat, mask_rows, *packed)
        return out_flat.reshape(B, S, D), {}


# ---------------------------------------------------------------------------
# Deterministic parameter initialization (synthetic; shapes from __init__).
# Linear weights stored as (fan_in, fan_out) so the math is x @ W + b.
# ---------------------------------------------------------------------------
def init_layer_params(key, d_model, d_ff):
    def linear(k, fan_in, fan_out):
        kw, kb = jax.random.split(k)
        lim = 1.0 / (fan_in ** 0.5)
        w = jax.random.uniform(kw, (fan_in, fan_out), jnp.float32, -lim, lim)
        b = jax.random.uniform(kb, (1, fan_out), jnp.float32, -lim, lim)
        return w, b

    ks = jax.random.split(key, 6)
    wq, bq = linear(ks[0], d_model, d_model)
    wk, bk = linear(ks[1], d_model, d_model)
    wv, bv = linear(ks[2], d_model, d_model)
    wo, bo = linear(ks[3], d_model, d_model)
    w1, b1 = linear(ks[4], d_model, d_ff)
    w2, b2 = linear(ks[5], d_ff, d_model)
    return dict(
        wq=wq, bq=bq, wk=wk, bk=bk, wv=wv, bv=bv, wo=wo, bo=bo,
        w1=w1, b1=b1, w2=w2, b2=b2,
        g1=jnp.ones((1, d_model), jnp.float32), beta1=jnp.zeros((1, d_model), jnp.float32),
        g2=jnp.ones((1, d_model), jnp.float32), beta2=jnp.zeros((1, d_model), jnp.float32),
    )


# ---------------------------------------------------------------------------
# Pure-JAX f32 reference (for correctness check).
# ---------------------------------------------------------------------------
def ref_layer(x, mask, p, num_heads, eps):
    B, S, D = x.shape
    dh = D // num_heads
    q = x @ p["wq"] + p["bq"]
    k = x @ p["wk"] + p["bk"]
    v = x @ p["wv"] + p["bv"]
    split = lambda t: t.reshape(B, S, num_heads, dh).transpose(0, 2, 1, 3)
    qh, kh, vh = split(q), split(k), split(v)
    logits = jnp.einsum("bhqd,bhkd->bhqk", qh, kh) / jnp.sqrt(jnp.float32(dh))
    logits = logits + mask * -1e9
    w = jax.nn.softmax(logits, axis=-1)
    attn = jnp.einsum("bhqk,bhkd->bhqd", w, vh).transpose(0, 2, 1, 3).reshape(B, S, D)
    attn_out = attn @ p["wo"] + p["bo"]

    def ln(t, g, b):
        mu = t.mean(-1, keepdims=True)
        var = ((t - mu) ** 2).mean(-1, keepdims=True)
        return (t - mu) / jnp.sqrt(var + eps) * g + b

    n1 = ln(attn_out + x, p["g1"], p["beta1"])
    ff = jnp.maximum(n1 @ p["w1"] + p["b1"], 0.0) @ p["w2"] + p["b2"]
    return ln(ff + n1, p["g2"], p["beta2"]), w


if __name__ == "__main__":
    # params: d_embed_enc=32, d_ff=64, num_heads=4, num_layers=2,
    #         ff_activation='relu', dropout=0.0 (eval), layer_norm_eps=1e-6
    B, S, D, H, FF, L = 2, 8, 32, 4, 64, 2
    EPS = 1e-6

    key = jax.random.PRNGKey(0)
    kx, *kl = jax.random.split(key, 1 + L)

    x = jax.random.normal(kx, (B, S, D), jnp.float32)
    # padding mask: 1.0 = padded position; last two positions of batch 1 padded.
    pad = jnp.zeros((B, S), jnp.float32).at[1, -2:].set(1.0)
    padding_mask = pad[:, None, None, :]  # (B, 1, 1, S)

    layer_params = [init_layer_params(kl[i], D, FF) for i in range(L)]

    out, attn_weights = transformer_encoder(
        x, padding_mask, layer_params, num_heads=H, eps=EPS,
        compute_dtype=jnp.float32, ff_activation="relu",
        return_attn_weights=True,
    )
    out = jax.block_until_ready(out)
    for i in range(L):
        jax.block_until_ready(attn_weights[f"layer_{i + 1}"]["self_attn"])

    # sanity check against pure-JAX f32 reference (tolerances cover default
    # TPU matmul precision on the reference side)
    xr = x
    for i in range(L):
        xr, wr = ref_layer(xr, padding_mask, layer_params[i], H, EPS)
        assert jnp.allclose(
            attn_weights[f"layer_{i + 1}"]["self_attn"], wr, atol=2e-2, rtol=2e-2
        ), f"attn weights mismatch at layer {i + 1}"
    assert jnp.allclose(out, xr, atol=3e-2, rtol=3e-2), "encoder output mismatch"

    print("KERNEL_OK")
</pallas_src>

<mosaic_0001>
module attributes {stable_mosaic.version = 11 : i64} {
  func.func @fused_encoder_kernel(%arg0: memref<16x32xf32, #tpu.memory_space<vmem>>, %arg1: memref<2x8xf32, #tpu.memory_space<vmem>>, %arg2: memref<2x32x96xf32, #tpu.memory_space<vmem>>, %arg3: memref<2x32x32xf32, #tpu.memory_space<vmem>>, %arg4: memref<2x32x64xf32, #tpu.memory_space<vmem>>, %arg5: memref<2x64x32xf32, #tpu.memory_space<vmem>>, %arg6: memref<2x8x96xf32, #tpu.memory_space<vmem>>, %arg7: memref<16x32xf32, #tpu.memory_space<vmem>>, %arg8: memref<2x8x64xf32, #tpu.memory_space<vmem>>) attributes {dimension_semantics = [], scalar_prefetch = 0 : i64, scratch_operands = 0 : i64, tpu.core_type = #tpu.core_type<tc>} {
    %c0 = arith.constant 0 : index
    %c0_0 = arith.constant 0 : index
    %0 = vector.load %arg0[%c0, %c0_0] : memref<16x32xf32, #tpu.memory_space<vmem>>, vector<16x32xf32>
    %cst = arith.constant 8.000000e+00 : f32
    %1 = math.sqrt %cst : f32
    %cst_1 = arith.constant 1.000000e+00 : f32
    %2 = arith.divf %cst_1, %1 : f32
    %c0_2 = arith.constant 0 : index
    %c0_3 = arith.constant 0 : index
    %3 = vector.load %arg1[%c0_2, %c0_3] : memref<2x8xf32, #tpu.memory_space<vmem>>, vector<2x8xf32>
    %cst_4 = arith.constant -1.000000e+09 : f32
    %4 = vector.broadcast %cst_4 : f32 to vector<2x8xf32>
    %5 = arith.mulf %3, %4 : vector<2x8xf32>
    %6 = vector.extract_strided_slice %5 {offsets = [0, 0], sizes = [1, 8], strides = [1, 1]} : vector<2x8xf32> to vector<1x8xf32>
    %7 = vector.extract_strided_slice %5 {offsets = [0, 0], sizes = [1, 8], strides = [1, 1]} : vector<2x8xf32> to vector<1x8xf32>
    %8 = vector.extract_strided_slice %5 {offsets = [0, 0], sizes = [1, 8], strides = [1, 1]} : vector<2x8xf32> to vector<1x8xf32>
    %9 = vector.extract_strided_slice %5 {offsets = [0, 0], sizes = [1, 8], strides = [1, 1]} : vector<2x8xf32> to vector<1x8xf32>
    %10 = vector.extract_strided_slice %5 {offsets = [1, 0], sizes = [1, 8], strides = [1, 1]} : vector<2x8xf32> to vector<1x8xf32>
    %11 = vector.extract_strided_slice %5 {offsets = [1, 0], sizes = [1, 8], strides = [1, 1]} : vector<2x8xf32> to vector<1x8xf32>
    %12 = vector.extract_strided_slice %5 {offsets = [1, 0], sizes = [1, 8], strides = [1, 1]} : vector<2x8xf32> to vector<1x8xf32>
    %13 = vector.extract_strided_slice %5 {offsets = [1, 0], sizes = [1, 8], strides = [1, 1]} : vector<2x8xf32> to vector<1x8xf32>
    %14 = vector.shape_cast %6 : vector<1x8xf32> to vector<1x1x8xf32>
    %15 = vector.shape_cast %7 : vector<1x8xf32> to vector<1x1x8xf32>
    %16 = vector.shape_cast %8 : vector<1x8xf32> to vector<1x1x8xf32>
    %17 = vector.shape_cast %9 : vector<1x8xf32> to vector<1x1x8xf32>
    %18 = vector.shape_cast %10 : vector<1x8xf32> to vector<1x1x8xf32>
    %19 = vector.shape_cast %11 : vector<1x8xf32> to vector<1x1x8xf32>
    %20 = vector.shape_cast %12 : vector<1x8xf32> to vector<1x1x8xf32>
    %21 = vector.shape_cast %13 : vector<1x8xf32> to vector<1x1x8xf32>
    %22 = tpu.concatenate %14, %15, %16, %17, %18, %19, %20, %21 in 0 : vector<1x1x8xf32>, vector<1x1x8xf32>, vector<1x1x8xf32>, vector<1x1x8xf32>, vector<1x1x8xf32>, vector<1x1x8xf32>, vector<1x1x8xf32>, vector<1x1x8xf32> -> vector<8x1x8xf32>
    %c0_5 = arith.constant 0 : index
    %c0_6 = arith.constant 0 : index
    %c0_7 = arith.constant 0 : index
    %23 = vector.load %arg6[%c0_5, %c0_6, %c0_7] : memref<2x8x96xf32, #tpu.memory_space<vmem>>, vector<1x8x96xf32>
    %24 = vector.shape_cast %23 : vector<1x8x96xf32> to vector<8x96xf32>
    %25 = vector.extract_strided_slice %24 {offsets = [0, 0], sizes = [1, 96], strides = [1, 1]} : vector<8x96xf32> to vector<1x96xf32>
    %26 = vector.extract_strided_slice %24 {offsets = [1, 0], sizes = [1, 32], strides = [1, 1]} : vector<8x96xf32> to vector<1x32xf32>
    %27 = vector.extract_strided_slice %24 {offsets = [2, 0], sizes = [1, 64], strides = [1, 1]} : vector<8x96xf32> to vector<1x64xf32>
    %28 = vector.extract_strided_slice %24 {offsets = [3, 0], sizes = [1, 32], strides = [1, 1]} : vector<8x96xf32> to vector<1x32xf32>
    %29 = vector.extract_strided_slice %24 {offsets = [4, 0], sizes = [1, 32], strides = [1, 1]} : vector<8x96xf32> to vector<1x32xf32>
    %30 = vector.extract_strided_slice %24 {offsets = [5, 0], sizes = [1, 32], strides = [1, 1]} : vector<8x96xf32> to vector<1x32xf32>
    %31 = vector.extract_strided_slice %24 {offsets = [6, 0], sizes = [1, 32], strides = [1, 1]} : vector<8x96xf32> to vector<1x32xf32>
    %32 = vector.extract_strided_slice %24 {offsets = [7, 0], sizes = [1, 32], strides = [1, 1]} : vector<8x96xf32> to vector<1x32xf32>
    %c0_8 = arith.constant 0 : index
    %c0_9 = arith.constant 0 : index
    %c0_10 = arith.constant 0 : index
    %33 = vector.load %arg2[%c0_8, %c0_9, %c0_10] : memref<2x32x96xf32, #tpu.memory_space<vmem>>, vector<1x32x96xf32>
    %34 = vector.shape_cast %33 : vector<1x32x96xf32> to vector<32x96xf32>
    %cst_11 = arith.constant dense<0.000000e+00> : vector<16x96xf32>
    %35 = tpu.matmul %0, %34, %cst_11 {dimension_numbers = #tpu.dot_dimension_numbers<[1], [0], [0], [1], [0, 0, 1, 1], [], []>} : vector<16x32xf32>, vector<32x96xf32>, vector<16x96xf32> -> vector<16x96xf32>
    %36 = vector.broadcast %25 : vector<1x96xf32> to vector<16x96xf32>
    %37 = arith.addf %35, %36 : vector<16x96xf32>
    %38 = vector.extract_strided_slice %37 {offsets = [0, 0], sizes = [8, 24], strides = [1, 1]} : vector<16x96xf32> to vector<8x24xf32>
    %39 = vector.extract_strided_slice %37 {offsets = [0, 24], sizes = [8, 24], strides = [1, 1]} : vector<16x96xf32> to vector<8x24xf32>
    %40 = vector.extract_strided_slice %37 {offsets = [0, 48], sizes = [8, 24], strides = [1, 1]} : vector<16x96xf32> to vector<8x24xf32>
    %41 = vector.extract_strided_slice %37 {offsets = [0, 72], sizes = [8, 24], strides = [1, 1]} : vector<16x96xf32> to vector<8x24xf32>
    %42 = vector.extract_strided_slice %37 {offsets = [8, 0], sizes = [8, 24], strides = [1, 1]} : vector<16x96xf32> to vector<8x24xf32>
    %43 = vector.extract_strided_slice %37 {offsets = [8, 24], sizes = [8, 24], strides = [1, 1]} : vector<16x96xf32> to vector<8x24xf32>
    %44 = vector.extract_strided_slice %37 {offsets = [8, 48], sizes = [8, 24], strides = [1, 1]} : vector<16x96xf32> to vector<8x24xf32>
    %45 = vector.extract_strided_slice %37 {offsets = [8, 72], sizes = [8, 24], strides = [1, 1]} : vector<16x96xf32> to vector<8x24xf32>
    %46 = vector.shape_cast %38 : vector<8x24xf32> to vector<1x8x24xf32>
    %47 = vector.shape_cast %39 : vector<8x24xf32> to vector<1x8x24xf32>
    %48 = vector.shape_cast %40 : vector<8x24xf32> to vector<1x8x24xf32>
    %49 = vector.shape_cast %41 : vector<8x24xf32> to vector<1x8x24xf32>
    %50 = vector.shape_cast %42 : vector<8x24xf32> to vector<1x8x24xf32>
    %51 = vector.shape_cast %43 : vector<8x24xf32> to vector<1x8x24xf32>
    %52 = vector.shape_cast %44 : vector<8x24xf32> to vector<1x8x24xf32>
    %53 = vector.shape_cast %45 : vector<8x24xf32> to vector<1x8x24xf32>
    %54 = tpu.concatenate %46, %47, %48, %49, %50, %51, %52, %53 in 0 : vector<1x8x24xf32>, vector<1x8x24xf32>, vector<1x8x24xf32>, vector<1x8x24xf32>, vector<1x8x24xf32>, vector<1x8x24xf32>, vector<1x8x24xf32>, vector<1x8x24xf32> -> vector<8x8x24xf32>
    %55 = vector.extract_strided_slice %54 {offsets = [0, 0, 0], sizes = [8, 8, 8], strides = [1, 1, 1]} : vector<8x8x24xf32> to vector<8x8x8xf32>
    %56 = vector.extract_strided_slice %54 {offsets = [0, 0, 8], sizes = [8, 8, 8], strides = [1, 1, 1]} : vector<8x8x24xf32> to vector<8x8x8xf32>
    %57 = vector.extract_strided_slice %54 {offsets = [0, 0, 16], sizes = [8, 8, 8], strides = [1, 1, 1]} : vector<8x8x24xf32> to vector<8x8x8xf32>
    "tpu.trace_start"() <{level = 10 : i32, message = "hqd,hkd->hqk"}> : () -> ()
    %cst_12 = arith.constant dense<0.000000e+00> : vector<8x8x8xf32>
    %58 = tpu.matmul %55, %56, %cst_12 {dimension_numbers = #tpu.dot_dimension_numbers<[2], [2], [1], [1], [0, 0, 0, 1, 1, 1], [0], [0]>} : vector<8x8x8xf32>, vector<8x8x8xf32>, vector<8x8x8xf32> -> vector<8x8x8xf32>
    "tpu.trace_stop"() : () -> ()
    %59 = vector.broadcast %2 : f32 to vector<8x8x8xf32>
    %60 = arith.mulf %58, %59 : vector<8x8x8xf32>
    %61 = vector.broadcast %22 : vector<8x1x8xf32> to vector<8x8x8xf32>
    %62 = arith.addf %60, %61 : vector<8x8x8xf32>
    %cst_13 = arith.constant dense<0xFF800000> : vector<8x8xf32>
    %63 = vector.multi_reduction <maximumf>, %62, %cst_13 [2] : vector<8x8x8xf32> to vector<8x8xf32>
    %64 = vector.shape_cast %63 : vector<8x8xf32> to vector<8x8x1xf32>
    %65 = vector.broadcast %64 : vector<8x8x1xf32> to vector<8x8x8xf32>
    %66 = arith.subf %62, %65 : vector<8x8x8xf32>
    %67 = math.exp %66 : vector<8x8x8xf32>
    %cst_14 = arith.constant dense<0.000000e+00> : vector<8x8xf32>
    %68 = vector.multi_reduction <add>, %67, %cst_14 [2] : vector<8x8x8xf32> to vector<8x8xf32>
    %69 = vector.shape_cast %68 : vector<8x8xf32> to vector<8x8x1xf32>
    %70 = vector.broadcast %69 : vector<8x8x1xf32> to vector<8x8x8xf32>
    %71 = arith.divf %67, %70 : vector<8x8x8xf32>
    %72 = vector.extract_strided_slice %71 {offsets = [0, 0, 0], sizes = [1, 8, 8], strides = [1, 1, 1]} : vector<8x8x8xf32> to vector<1x8x8xf32>
    %73 = vector.shape_cast %72 : vector<1x8x8xf32> to vector<8x8xf32>
    %74 = vector.extract_strided_slice %71 {offsets = [1, 0, 0], sizes = [1, 8, 8], strides = [1, 1, 1]} : vector<8x8x8xf32> to vector<1x8x8xf32>
    %75 = vector.shape_cast %74 : vector<1x8x8xf32> to vector<8x8xf32>
    %76 = vector.extract_strided_slice %71 {offsets = [2, 0, 0], sizes = [1, 8, 8], strides = [1, 1, 1]} : vector<8x8x8xf32> to vector<1x8x8xf32>
    %77 = vector.shape_cast %76 : vector<1x8x8xf32> to vector<8x8xf32>
    %78 = vector.extract_strided_slice %71 {offsets = [3, 0, 0], sizes = [1, 8, 8], strides = [1, 1, 1]} : vector<8x8x8xf32> to vector<1x8x8xf32>
    %79 = vector.shape_cast %78 : vector<1x8x8xf32> to vector<8x8xf32>
    %80 = vector.extract_strided_slice %71 {offsets = [4, 0, 0], sizes = [1, 8, 8], strides = [1, 1, 1]} : vector<8x8x8xf32> to vector<1x8x8xf32>
    %81 = vector.shape_cast %80 : vector<1x8x8xf32> to vector<8x8xf32>
    %82 = vector.extract_strided_slice %71 {offsets = [5, 0, 0], sizes = [1, 8, 8], strides = [1, 1, 1]} : vector<8x8x8xf32> to vector<1x8x8xf32>
    %83 = vector.shape_cast %82 : vector<1x8x8xf32> to vector<8x8xf32>
    %84 = vector.extract_strided_slice %71 {offsets = [6, 0, 0], sizes = [1, 8, 8], strides = [1, 1, 1]} : vector<8x8x8xf32> to vector<1x8x8xf32>
    %85 = vector.shape_cast %84 : vector<1x8x8xf32> to vector<8x8xf32>
    %86 = vector.extract_strided_slice %71 {offsets = [7, 0, 0], sizes = [1, 8, 8], strides = [1, 1, 1]} : vector<8x8x8xf32> to vector<1x8x8xf32>
    %87 = vector.shape_cast %86 : vector<1x8x8xf32> to vector<8x8xf32>
    %88 = tpu.concatenate %73, %75, %77, %79, %81, %83, %85, %87 in 1 : vector<8x8xf32>, vector<8x8xf32>, vector<8x8xf32>, vector<8x8xf32>, vector<8x8xf32>, vector<8x8xf32>, vector<8x8xf32>, vector<8x8xf32> -> vector<8x64xf32>
    %c0_15 = arith.constant 0 : index
    %c0_16 = arith.constant 0 : index
    %c0_17 = arith.constant 0 : index
    %89 = vector.load %arg8[%c0_15, %c0_16, %c0_17] : memref<2x8x64xf32, #tpu.memory_space<vmem>>, vector<1x8x64xf32>
    %90 = vector.shape_cast %89 : vector<1x8x64xf32> to vector<8x64xf32>
    %91 = vector.shape_cast %88 : vector<8x64xf32> to vector<1x8x64xf32>
    tpu.vector_store %arg8[%c0_15, %c0_16, %c0_17], %91 {strides = array<i32>} : memref<2x8x64xf32, #tpu.memory_space<vmem>>, vector<1x8x64xf32>,
    "tpu.trace_start"() <{level = 10 : i32, message = "hqk,hkd->hqd"}> : () -> ()
    %cst_18 = arith.constant dense<0.000000e+00> : vector<8x8x8xf32>
    %92 = tpu.matmul %71, %57, %cst_18 {dimension_numbers = #tpu.dot_dimension_numbers<[2], [1], [1], [2], [0, 0, 0, 1, 1, 2], [0], [0]>} : vector<8x8x8xf32>, vector<8x8x8xf32>, vector<8x8x8xf32> -> vector<8x8x8xf32>
    "tpu.trace_stop"() : () -> ()
    %93 = vector.extract_strided_slice %92 {offsets = [0, 0, 0], sizes = [1, 8, 8], strides = [1, 1, 1]} : vector<8x8x8xf32> to vector<1x8x8xf32>
    %94 = vector.shape_cast %93 : vector<1x8x8xf32> to vector<8x8xf32>
    %95 = vector.extract_strided_slice %92 {offsets = [1, 0, 0], sizes = [1, 8, 8], strides = [1, 1, 1]} : vector<8x8x8xf32> to vector<1x8x8xf32>
    %96 = vector.shape_cast %95 : vector<1x8x8xf32> to vector<8x8xf32>
    %97 = vector.extract_strided_slice %92 {offsets = [2, 0, 0], sizes = [1, 8, 8], strides = [1, 1, 1]} : vector<8x8x8xf32> to vector<1x8x8xf32>
    %98 = vector.shape_cast %97 : vector<1x8x8xf32> to vector<8x8xf32>
    %99 = vector.extract_strided_slice %92 {offsets = [3, 0, 0], sizes = [1, 8, 8], strides = [1, 1, 1]} : vector<8x8x8xf32> to vector<1x8x8xf32>
    %100 = vector.shape_cast %99 : vector<1x8x8xf32> to vector<8x8xf32>
    %101 = tpu.concatenate %94, %96, %98, %100 in 1 : vector<8x8xf32>, vector<8x8xf32>, vector<8x8xf32>, vector<8x8xf32> -> vector<8x32xf32>
    %102 = vector.extract_strided_slice %92 {offsets = [4, 0, 0], sizes = [1, 8, 8], strides = [1, 1, 1]} : vector<8x8x8xf32> to vector<1x8x8xf32>
    %103 = vector.shape_cast %102 : vector<1x8x8xf32> to vector<8x8xf32>
    %104 = vector.extract_strided_slice %92 {offsets = [5, 0, 0], sizes = [1, 8, 8], strides = [1, 1, 1]} : vector<8x8x8xf32> to vector<1x8x8xf32>
    %105 = vector.shape_cast %104 : vector<1x8x8xf32> to vector<8x8xf32>
    %106 = vector.extract_strided_slice %92 {offsets = [6, 0, 0], sizes = [1, 8, 8], strides = [1, 1, 1]} : vector<8x8x8xf32> to vector<1x8x8xf32>
    %107 = vector.shape_cast %106 : vector<1x8x8xf32> to vector<8x8xf32>
    %108 = vector.extract_strided_slice %92 {offsets = [7, 0, 0], sizes = [1, 8, 8], strides = [1, 1, 1]} : vector<8x8x8xf32> to vector<1x8x8xf32>
    %109 = vector.shape_cast %108 : vector<1x8x8xf32> to vector<8x8xf32>
    %110 = tpu.concatenate %103, %105, %107, %109 in 1 : vector<8x8xf32>, vector<8x8xf32>, vector<8x8xf32>, vector<8x8xf32> -> vector<8x32xf32>
    %111 = tpu.concatenate %101, %110 in 0 : vector<8x32xf32>, vector<8x32xf32> -> vector<16x32xf32>
    %c0_19 = arith.constant 0 : index
    %c0_20 = arith.constant 0 : index
    %c0_21 = arith.constant 0 : index
    %112 = vector.load %arg3[%c0_19, %c0_20, %c0_21] : memref<2x32x32xf32, #tpu.memory_space<vmem>>, vector<1x32x32xf32>
    %113 = vector.shape_cast %112 : vector<1x32x32xf32> to vector<32x32xf32>
    %cst_22 = arith.constant dense<0.000000e+00> : vector<16x32xf32>
    %114 = tpu.matmul %111, %113, %cst_22 {dimension_numbers = #tpu.dot_dimension_numbers<[1], [0], [0], [1], [0, 0, 1, 1], [], []>} : vector<16x32xf32>, vector<32x32xf32>, vector<16x32xf32> -> vector<16x32xf32>
    %115 = vector.broadcast %26 : vector<1x32xf32> to vector<16x32xf32>
    %116 = arith.addf %114, %115 : vector<16x32xf32>
    %117 = arith.addf %116, %0 : vector<16x32xf32>
    %cst_23 = arith.constant dense<0.000000e+00> : vector<16xf32>
    %118 = vector.multi_reduction <add>, %117, %cst_23 [1] : vector<16x32xf32> to vector<16xf32>
    %119 = vector.shape_cast %118 : vector<16xf32> to vector<16x1xf32>
    %cst_24 = arith.constant 3.200000e+01 : f32
    %120 = vector.broadcast %cst_24 : f32 to vector<16x1xf32>
    %121 = arith.divf %119, %120 : vector<16x1xf32>
    %122 = vector.broadcast %121 : vector<16x1xf32> to vector<16x32xf32>
    %123 = arith.subf %117, %122 : vector<16x32xf32>
    %124 = arith.mulf %123, %123 : vector<16x32xf32>
    %cst_25 = arith.constant dense<0.000000e+00> : vector<16xf32>
    %125 = vector.multi_reduction <add>, %124, %cst_25 [1] : vector<16x32xf32> to vector<16xf32>
    %126 = vector.shape_cast %125 : vector<16xf32> to vector<16x1xf32>
    %cst_26 = arith.constant 3.200000e+01 : f32
    %127 = vector.broadcast %cst_26 : f32 to vector<16x1xf32>
    %128 = arith.divf %126, %127 : vector<16x1xf32>
    %129 = vector.broadcast %121 : vector<16x1xf32> to vector<16x32xf32>
    %130 = arith.subf %117, %129 : vector<16x32xf32>
    %cst_27 = arith.constant 9.99999997E-7 : f32
    %131 = vector.broadcast %cst_27 : f32 to vector<16x1xf32>
    %132 = arith.addf %128, %131 : vector<16x1xf32>
    %133 = math.rsqrt %132 : vector<16x1xf32>
    %134 = vector.broadcast %133 : vector<16x1xf32> to vector<16x32xf32>
    %135 = arith.mulf %130, %134 : vector<16x32xf32>
    %136 = vector.broadcast %29 : vector<1x32xf32> to vector<16x32xf32>
    %137 = arith.mulf %135, %136 : vector<16x32xf32>
    %138 = vector.broadcast %30 : vector<1x32xf32> to vector<16x32xf32>
    %139 = arith.addf %137, %138 : vector<16x32xf32>
    %c0_28 = arith.constant 0 : index
    %c0_29 = arith.constant 0 : index
    %c0_30 = arith.constant 0 : index
    %140 = vector.load %arg4[%c0_28, %c0_29, %c0_30] : memref<2x32x64xf32, #tpu.memory_space<vmem>>, vector<1x32x64xf32>
    %141 = vector.shape_cast %140 : vector<1x32x64xf32> to vector<32x64xf32>
    %cst_31 = arith.constant dense<0.000000e+00> : vector<16x64xf32>
    %142 = tpu.matmul %139, %141, %cst_31 {dimension_numbers = #tpu.dot_dimension_numbers<[1], [0], [0], [1], [0, 0, 1, 1], [], []>} : vector<16x32xf32>, vector<32x64xf32>, vector<16x64xf32> -> vector<16x64xf32>
    %143 = vector.broadcast %27 : vector<1x64xf32> to vector<16x64xf32>
    %144 = arith.addf %142, %143 : vector<16x64xf32>
    %cst_32 = arith.constant 0.000000e+00 : f32
    %145 = vector.broadcast %cst_32 : f32 to vector<16x64xf32>
    %146 = arith.maximumf %144, %145 : vector<16x64xf32>
    %c0_33 = arith.constant 0 : index
    %c0_34 = arith.constant 0 : index
    %c0_35 = arith.constant 0 : index
    %147 = vector.load %arg5[%c0_33, %c0_34, %c0_35] : memref<2x64x32xf32, #tpu.memory_space<vmem>>, vector<1x64x32xf32>
    %148 = vector.shape_cast %147 : vector<1x64x32xf32> to vector<64x32xf32>
    %cst_36 = arith.constant dense<0.000000e+00> : vector<16x32xf32>
    %149 = tpu.matmul %146, %148, %cst_36 {dimension_numbers = #tpu.dot_dimension_numbers<[1], [0], [0], [1], [0, 0, 1, 1], [], []>} : vector<16x64xf32>, vector<64x32xf32>, vector<16x32xf32> -> vector<16x32xf32>
    %150 = vector.broadcast %28 : vector<1x32xf32> to vector<16x32xf32>
    %151 = arith.addf %149, %150 : vector<16x32xf32>
    %152 = arith.addf %151, %139 : vector<16x32xf32>
    %cst_37 = arith.constant dense<0.000000e+00> : vector<16xf32>
    %153 = vector.multi_reduction <add>, %152, %cst_37 [1] : vector<16x32xf32> to vector<16xf32>
    %154 = vector.shape_cast %153 : vector<16xf32> to vector<16x1xf32>
    %cst_38 = arith.constant 3.200000e+01 : f32
    %155 = vector.broadcast %cst_38 : f32 to vector<16x1xf32>
    %156 = arith.divf %154, %155 : vector<16x1xf32>
    %157 = vector.broadcast %156 : vector<16x1xf32> to vector<16x32xf32>
    %158 = arith.subf %152, %157 : vector<16x32xf32>
    %159 = arith.mulf %158, %158 : vector<16x32xf32>
    %cst_39 = arith.constant dense<0.000000e+00> : vector<16xf32>
    %160 = vector.multi_reduction <add>, %159, %cst_39 [1] : vector<16x32xf32> to vector<16xf32>
    %161 = vector.shape_cast %160 : vector<16xf32> to vector<16x1xf32>
    %cst_40 = arith.constant 3.200000e+01 : f32
    %162 = vector.broadcast %cst_40 : f32 to vector<16x1xf32>
    %163 = arith.divf %161, %162 : vector<16x1xf32>
    %164 = vector.broadcast %156 : vector<16x1xf32> to vector<16x32xf32>
    %165 = arith.subf %152, %164 : vector<16x32xf32>
    %cst_41 = arith.constant 9.99999997E-7 : f32
    %166 = vector.broadcast %cst_41 : f32 to vector<16x1xf32>
    %167 = arith.addf %163, %166 : vector<16x1xf32>
    %168 = math.rsqrt %167 : vector<16x1xf32>
    %169 = vector.broadcast %168 : vector<16x1xf32> to vector<16x32xf32>
    %170 = arith.mulf %165, %169 : vector<16x32xf32>
    %171 = vector.broadcast %31 : vector<1x32xf32> to vector<16x32xf32>
    %172 = arith.mulf %170, %171 : vector<16x32xf32>
    %173 = vector.broadcast %32 : vector<1x32xf32> to vector<16x32xf32>
    %174 = arith.addf %172, %173 : vector<16x32xf32>
    %c1 = arith.constant 1 : index
    %c0_42 = arith.constant 0 : index
    %c0_43 = arith.constant 0 : index
    %175 = vector.load %arg6[%c1, %c0_42, %c0_43] : memref<2x8x96xf32, #tpu.memory_space<vmem>>, vector<1x8x96xf32>
    %176 = vector.shape_cast %175 : vector<1x8x96xf32> to vector<8x96xf32>
    %177 = vector.extract_strided_slice %176 {offsets = [0, 0], sizes = [1, 96], strides = [1, 1]} : vector<8x96xf32> to vector<1x96xf32>
    %178 = vector.extract_strided_slice %176 {offsets = [1, 0], sizes = [1, 32], strides = [1, 1]} : vector<8x96xf32> to vector<1x32xf32>
    %179 = vector.extract_strided_slice %176 {offsets = [2, 0], sizes = [1, 64], strides = [1, 1]} : vector<8x96xf32> to vector<1x64xf32>
    %180 = vector.extract_strided_slice %176 {offsets = [3, 0], sizes = [1, 32], strides = [1, 1]} : vector<8x96xf32> to vector<1x32xf32>
    %181 = vector.extract_strided_slice %176 {offsets = [4, 0], sizes = [1, 32], strides = [1, 1]} : vector<8x96xf32> to vector<1x32xf32>
    %182 = vector.extract_strided_slice %176 {offsets = [5, 0], sizes = [1, 32], strides = [1, 1]} : vector<8x96xf32> to vector<1x32xf32>
    %183 = vector.extract_strided_slice %176 {offsets = [6, 0], sizes = [1, 32], strides = [1, 1]} : vector<8x96xf32> to vector<1x32xf32>
    %184 = vector.extract_strided_slice %176 {offsets = [7, 0], sizes = [1, 32], strides = [1, 1]} : vector<8x96xf32> to vector<1x32xf32>
    %c1_44 = arith.constant 1 : index
    %c0_45 = arith.constant 0 : index
    %c0_46 = arith.constant 0 : index
    %185 = vector.load %arg2[%c1_44, %c0_45, %c0_46] : memref<2x32x96xf32, #tpu.memory_space<vmem>>, vector<1x32x96xf32>
    %186 = vector.shape_cast %185 : vector<1x32x96xf32> to vector<32x96xf32>
    %cst_47 = arith.constant dense<0.000000e+00> : vector<16x96xf32>
    %187 = tpu.matmul %174, %186, %cst_47 {dimension_numbers = #tpu.dot_dimension_numbers<[1], [0], [0], [1], [0, 0, 1, 1], [], []>} : vector<16x32xf32>, vector<32x96xf32>, vector<16x96xf32> -> vector<16x96xf32>
    %188 = vector.broadcast %177 : vector<1x96xf32> to vector<16x96xf32>
    %189 = arith.addf %187, %188 : vector<16x96xf32>
    %190 = vector.extract_strided_slice %189 {offsets = [0, 0], sizes = [8, 24], strides = [1, 1]} : vector<16x96xf32> to vector<8x24xf32>
    %191 = vector.extract_strided_slice %189 {offsets = [0, 24], sizes = [8, 24], strides = [1, 1]} : vector<16x96xf32> to vector<8x24xf32>
    %192 = vector.extract_strided_slice %189 {offsets = [0, 48], sizes = [8, 24], strides = [1, 1]} : vector<16x96xf32> to vector<8x24xf32>
    %193 = vector.extract_strided_slice %189 {offsets = [0, 72], sizes = [8, 24], strides = [1, 1]} : vector<16x96xf32> to vector<8x24xf32>
    %194 = vector.extract_strided_slice %189 {offsets = [8, 0], sizes = [8, 24], strides = [1, 1]} : vector<16x96xf32> to vector<8x24xf32>
    %195 = vector.extract_strided_slice %189 {offsets = [8, 24], sizes = [8, 24], strides = [1, 1]} : vector<16x96xf32> to vector<8x24xf32>
    %196 = vector.extract_strided_slice %189 {offsets = [8, 48], sizes = [8, 24], strides = [1, 1]} : vector<16x96xf32> to vector<8x24xf32>
    %197 = vector.extract_strided_slice %189 {offsets = [8, 72], sizes = [8, 24], strides = [1, 1]} : vector<16x96xf32> to vector<8x24xf32>
    %198 = vector.shape_cast %190 : vector<8x24xf32> to vector<1x8x24xf32>
    %199 = vector.shape_cast %191 : vector<8x24xf32> to vector<1x8x24xf32>
    %200 = vector.shape_cast %192 : vector<8x24xf32> to vector<1x8x24xf32>
    %201 = vector.shape_cast %193 : vector<8x24xf32> to vector<1x8x24xf32>
    %202 = vector.shape_cast %194 : vector<8x24xf32> to vector<1x8x24xf32>
    %203 = vector.shape_cast %195 : vector<8x24xf32> to vector<1x8x24xf32>
    %204 = vector.shape_cast %196 : vector<8x24xf32> to vector<1x8x24xf32>
    %205 = vector.shape_cast %197 : vector<8x24xf32> to vector<1x8x24xf32>
    %206 = tpu.concatenate %198, %199, %200, %201, %202, %203, %204, %205 in 0 : vector<1x8x24xf32>, vector<1x8x24xf32>, vector<1x8x24xf32>, vector<1x8x24xf32>, vector<1x8x24xf32>, vector<1x8x24xf32>, vector<1x8x24xf32>, vector<1x8x24xf32> -> vector<8x8x24xf32>
    %207 = vector.extract_strided_slice %206 {offsets = [0, 0, 0], sizes = [8, 8, 8], strides = [1, 1, 1]} : vector<8x8x24xf32> to vector<8x8x8xf32>
    %208 = vector.extract_strided_slice %206 {offsets = [0, 0, 8], sizes = [8, 8, 8], strides = [1, 1, 1]} : vector<8x8x24xf32> to vector<8x8x8xf32>
    %209 = vector.extract_strided_slice %206 {offsets = [0, 0, 16], sizes = [8, 8, 8], strides = [1, 1, 1]} : vector<8x8x24xf32> to vector<8x8x8xf32>
    "tpu.trace_start"() <{level = 10 : i32, message = "hqd,hkd->hqk"}> : () -> ()
    %cst_48 = arith.constant dense<0.000000e+00> : vector<8x8x8xf32>
    %210 = tpu.matmul %207, %208, %cst_48 {dimension_numbers = #tpu.dot_dimension_numbers<[2], [2], [1], [1], [0, 0, 0, 1, 1, 1], [0], [0]>} : vector<8x8x8xf32>, vector<8x8x8xf32>, vector<8x8x8xf32> -> vector<8x8x8xf32>
    "tpu.trace_stop"() : () -> ()
    %211 = vector.broadcast %2 : f32 to vector<8x8x8xf32>
    %212 = arith.mulf %210, %211 : vector<8x8x8xf32>
    %213 = vector.broadcast %22 : vector<8x1x8xf32> to vector<8x8x8xf32>
    %214 = arith.addf %212, %213 : vector<8x8x8xf32>
    %cst_49 = arith.constant dense<0xFF800000> : vector<8x8xf32>
    %215 = vector.multi_reduction <maximumf>, %214, %cst_49 [2] : vector<8x8x8xf32> to vector<8x8xf32>
    %216 = vector.shape_cast %215 : vector<8x8xf32> to vector<8x8x1xf32>
    %217 = vector.broadcast %216 : vector<8x8x1xf32> to vector<8x8x8xf32>
    %218 = arith.subf %214, %217 : vector<8x8x8xf32>
    %219 = math.exp %218 : vector<8x8x8xf32>
    %cst_50 = arith.constant dense<0.000000e+00> : vector<8x8xf32>
    %220 = vector.multi_reduction <add>, %219, %cst_50 [2] : vector<8x8x8xf32> to vector<8x8xf32>
    %221 = vector.shape_cast %220 : vector<8x8xf32> to vector<8x8x1xf32>
    %222 = vector.broadcast %221 : vector<8x8x1xf32> to vector<8x8x8xf32>
    %223 = arith.divf %219, %222 : vector<8x8x8xf32>
    %224 = vector.extract_strided_slice %223 {offsets = [0, 0, 0], sizes = [1, 8, 8], strides = [1, 1, 1]} : vector<8x8x8xf32> to vector<1x8x8xf32>
    %225 = vector.shape_cast %224 : vector<1x8x8xf32> to vector<8x8xf32>
    %226 = vector.extract_strided_slice %223 {offsets = [1, 0, 0], sizes = [1, 8, 8], strides = [1, 1, 1]} : vector<8x8x8xf32> to vector<1x8x8xf32>
    %227 = vector.shape_cast %226 : vector<1x8x8xf32> to vector<8x8xf32>
    %228 = vector.extract_strided_slice %223 {offsets = [2, 0, 0], sizes = [1, 8, 8], strides = [1, 1, 1]} : vector<8x8x8xf32> to vector<1x8x8xf32>
    %229 = vector.shape_cast %228 : vector<1x8x8xf32> to vector<8x8xf32>
    %230 = vector.extract_strided_slice %223 {offsets = [3, 0, 0], sizes = [1, 8, 8], strides = [1, 1, 1]} : vector<8x8x8xf32> to vector<1x8x8xf32>
    %231 = vector.shape_cast %230 : vector<1x8x8xf32> to vector<8x8xf32>
    %232 = vector.extract_strided_slice %223 {offsets = [4, 0, 0], sizes = [1, 8, 8], strides = [1, 1, 1]} : vector<8x8x8xf32> to vector<1x8x8xf32>
    %233 = vector.shape_cast %232 : vector<1x8x8xf32> to vector<8x8xf32>
    %234 = vector.extract_strided_slice %223 {offsets = [5, 0, 0], sizes = [1, 8, 8], strides = [1, 1, 1]} : vector<8x8x8xf32> to vector<1x8x8xf32>
    %235 = vector.shape_cast %234 : vector<1x8x8xf32> to vector<8x8xf32>
    %236 = vector.extract_strided_slice %223 {offsets = [6, 0, 0], sizes = [1, 8, 8], strides = [1, 1, 1]} : vector<8x8x8xf32> to vector<1x8x8xf32>
    %237 = vector.shape_cast %236 : vector<1x8x8xf32> to vector<8x8xf32>
    %238 = vector.extract_strided_slice %223 {offsets = [7, 0, 0], sizes = [1, 8, 8], strides = [1, 1, 1]} : vector<8x8x8xf32> to vector<1x8x8xf32>
    %239 = vector.shape_cast %238 : vector<1x8x8xf32> to vector<8x8xf32>
    %240 = tpu.concatenate %225, %227, %229, %231, %233, %235, %237, %239 in 1 : vector<8x8xf32>, vector<8x8xf32>, vector<8x8xf32>, vector<8x8xf32>, vector<8x8xf32>, vector<8x8xf32>, vector<8x8xf32>, vector<8x8xf32> -> vector<8x64xf32>
    %c1_51 = arith.constant 1 : index
    %c0_52 = arith.constant 0 : index
    %c0_53 = arith.constant 0 : index
    %241 = vector.load %arg8[%c1_51, %c0_52, %c0_53] : memref<2x8x64xf32, #tpu.memory_space<vmem>>, vector<1x8x64xf32>
    %242 = vector.shape_cast %241 : vector<1x8x64xf32> to vector<8x64xf32>
    %243 = vector.shape_cast %240 : vector<8x64xf32> to vector<1x8x64xf32>
    tpu.vector_store %arg8[%c1_51, %c0_52, %c0_53], %243 {strides = array<i32>} : memref<2x8x64xf32, #tpu.memory_space<vmem>>, vector<1x8x64xf32>,
    "tpu.trace_start"() <{level = 10 : i32, message = "hqk,hkd->hqd"}> : () -> ()
    %cst_54 = arith.constant dense<0.000000e+00> : vector<8x8x8xf32>
    %244 = tpu.matmul %223, %209, %cst_54 {dimension_numbers = #tpu.dot_dimension_numbers<[2], [1], [1], [2], [0, 0, 0, 1, 1, 2], [0], [0]>} : vector<8x8x8xf32>, vector<8x8x8xf32>, vector<8x8x8xf32> -> vector<8x8x8xf32>
    "tpu.trace_stop"() : () -> ()
    %245 = vector.extract_strided_slice %244 {offsets = [0, 0, 0], sizes = [1, 8, 8], strides = [1, 1, 1]} : vector<8x8x8xf32> to vector<1x8x8xf32>
    %246 = vector.shape_cast %245 : vector<1x8x8xf32> to vector<8x8xf32>
    %247 = vector.extract_strided_slice %244 {offsets = [1, 0, 0], sizes = [1, 8, 8], strides = [1, 1, 1]} : vector<8x8x8xf32> to vector<1x8x8xf32>
    %248 = vector.shape_cast %247 : vector<1x8x8xf32> to vector<8x8xf32>
    %249 = vector.extract_strided_slice %244 {offsets = [2, 0, 0], sizes = [1, 8, 8], strides = [1, 1, 1]} : vector<8x8x8xf32> to vector<1x8x8xf32>
    %250 = vector.shape_cast %249 : vector<1x8x8xf32> to vector<8x8xf32>
    %251 = vector.extract_strided_slice %244 {offsets = [3, 0, 0], sizes = [1, 8, 8], strides = [1, 1, 1]} : vector<8x8x8xf32> to vector<1x8x8xf32>
    %252 = vector.shape_cast %251 : vector<1x8x8xf32> to vector<8x8xf32>
    %253 = tpu.concatenate %246, %248, %250, %252 in 1 : vector<8x8xf32>, vector<8x8xf32>, vector<8x8xf32>, vector<8x8xf32> -> vector<8x32xf32>
    %254 = vector.extract_strided_slice %244 {offsets = [4, 0, 0], sizes = [1, 8, 8], strides = [1, 1, 1]} : vector<8x8x8xf32> to vector<1x8x8xf32>
    %255 = vector.shape_cast %254 : vector<1x8x8xf32> to vector<8x8xf32>
    %256 = vector.extract_strided_slice %244 {offsets = [5, 0, 0], sizes = [1, 8, 8], strides = [1, 1, 1]} : vector<8x8x8xf32> to vector<1x8x8xf32>
    %257 = vector.shape_cast %256 : vector<1x8x8xf32> to vector<8x8xf32>
    %258 = vector.extract_strided_slice %244 {offsets = [6, 0, 0], sizes = [1, 8, 8], strides = [1, 1, 1]} : vector<8x8x8xf32> to vector<1x8x8xf32>
    %259 = vector.shape_cast %258 : vector<1x8x8xf32> to vector<8x8xf32>
    %260 = vector.extract_strided_slice %244 {offsets = [7, 0, 0], sizes = [1, 8, 8], strides = [1, 1, 1]} : vector<8x8x8xf32> to vector<1x8x8xf32>
    %261 = vector.shape_cast %260 : vector<1x8x8xf32> to vector<8x8xf32>
    %262 = tpu.concatenate %255, %257, %259, %261 in 1 : vector<8x8xf32>, vector<8x8xf32>, vector<8x8xf32>, vector<8x8xf32> -> vector<8x32xf32>
    %263 = tpu.concatenate %253, %262 in 0 : vector<8x32xf32>, vector<8x32xf32> -> vector<16x32xf32>
    %c1_55 = arith.constant 1 : index
    %c0_56 = arith.constant 0 : index
    %c0_57 = arith.constant 0 : index
    %264 = vector.load %arg3[%c1_55, %c0_56, %c0_57] : memref<2x32x32xf32, #tpu.memory_space<vmem>>, vector<1x32x32xf32>
    %265 = vector.shape_cast %264 : vector<1x32x32xf32> to vector<32x32xf32>
    %cst_58 = arith.constant dense<0.000000e+00> : vector<16x32xf32>
    %266 = tpu.matmul %263, %265, %cst_58 {dimension_numbers = #tpu.dot_dimension_numbers<[1], [0], [0], [1], [0, 0, 1, 1], [], []>} : vector<16x32xf32>, vector<32x32xf32>, vector<16x32xf32> -> vector<16x32xf32>
    %267 = vector.broadcast %178 : vector<1x32xf32> to vector<16x32xf32>
    %268 = arith.addf %266, %267 : vector<16x32xf32>
    %269 = arith.addf %268, %174 : vector<16x32xf32>
    %cst_59 = arith.constant dense<0.000000e+00> : vector<16xf32>
    %270 = vector.multi_reduction <add>, %269, %cst_59 [1] : vector<16x32xf32> to vector<16xf32>
    %271 = vector.shape_cast %270 : vector<16xf32> to vector<16x1xf32>
    %cst_60 = arith.constant 3.200000e+01 : f32
    %272 = vector.broadcast %cst_60 : f32 to vector<16x1xf32>
    %273 = arith.divf %271, %272 : vector<16x1xf32>
    %274 = vector.broadcast %273 : vector<16x1xf32> to vector<16x32xf32>
    %275 = arith.subf %269, %274 : vector<16x32xf32>
    %276 = arith.mulf %275, %275 : vector<16x32xf32>
    %cst_61 = arith.constant dense<0.000000e+00> : vector<16xf32>
    %277 = vector.multi_reduction <add>, %276, %cst_61 [1] : vector<16x32xf32> to vector<16xf32>
    %278 = vector.shape_cast %277 : vector<16xf32> to vector<16x1xf32>
    %cst_62 = arith.constant 3.200000e+01 : f32
    %279 = vector.broadcast %cst_62 : f32 to vector<16x1xf32>
    %280 = arith.divf %278, %279 : vector<16x1xf32>
    %281 = vector.broadcast %273 : vector<16x1xf32> to vector<16x32xf32>
    %282 = arith.subf %269, %281 : vector<16x32xf32>
    %cst_63 = arith.constant 9.99999997E-7 : f32
    %283 = vector.broadcast %cst_63 : f32 to vector<16x1xf32>
    %284 = arith.addf %280, %283 : vector<16x1xf32>
    %285 = math.rsqrt %284 : vector<16x1xf32>
    %286 = vector.broadcast %285 : vector<16x1xf32> to vector<16x32xf32>
    %287 = arith.mulf %282, %286 : vector<16x32xf32>
    %288 = vector.broadcast %181 : vector<1x32xf32> to vector<16x32xf32>
    %289 = arith.mulf %287, %288 : vector<16x32xf32>
    %290 = vector.broadcast %182 : vector<1x32xf32> to vector<16x32xf32>
    %291 = arith.addf %289, %290 : vector<16x32xf32>
    %c1_64 = arith.constant 1 : index
    %c0_65 = arith.constant 0 : index
    %c0_66 = arith.constant 0 : index
    %292 = vector.load %arg4[%c1_64, %c0_65, %c0_66] : memref<2x32x64xf32, #tpu.memory_space<vmem>>, vector<1x32x64xf32>
    %293 = vector.shape_cast %292 : vector<1x32x64xf32> to vector<32x64xf32>
    %cst_67 = arith.constant dense<0.000000e+00> : vector<16x64xf32>
    %294 = tpu.matmul %291, %293, %cst_67 {dimension_numbers = #tpu.dot_dimension_numbers<[1], [0], [0], [1], [0, 0, 1, 1], [], []>} : vector<16x32xf32>, vector<32x64xf32>, vector<16x64xf32> -> vector<16x64xf32>
    %295 = vector.broadcast %179 : vector<1x64xf32> to vector<16x64xf32>
    %296 = arith.addf %294, %295 : vector<16x64xf32>
    %cst_68 = arith.constant 0.000000e+00 : f32
    %297 = vector.broadcast %cst_68 : f32 to vector<16x64xf32>
    %298 = arith.maximumf %296, %297 : vector<16x64xf32>
    %c1_69 = arith.constant 1 : index
    %c0_70 = arith.constant 0 : index
    %c0_71 = arith.constant 0 : index
    %299 = vector.load %arg5[%c1_69, %c0_70, %c0_71] : memref<2x64x32xf32, #tpu.memory_space<vmem>>, vector<1x64x32xf32>
    %300 = vector.shape_cast %299 : vector<1x64x32xf32> to vector<64x32xf32>
    %cst_72 = arith.constant dense<0.000000e+00> : vector<16x32xf32>
    %301 = tpu.matmul %298, %300, %cst_72 {dimension_numbers = #tpu.dot_dimension_numbers<[1], [0], [0], [1], [0, 0, 1, 1], [], []>} : vector<16x64xf32>, vector<64x32xf32>, vector<16x32xf32> -> vector<16x32xf32>
    %302 = vector.broadcast %180 : vector<1x32xf32> to vector<16x32xf32>
    %303 = arith.addf %301, %302 : vector<16x32xf32>
    %304 = arith.addf %303, %291 : vector<16x32xf32>
    %cst_73 = arith.constant dense<0.000000e+00> : vector<16xf32>
    %305 = vector.multi_reduction <add>, %304, %cst_73 [1] : vector<16x32xf32> to vector<16xf32>
    %306 = vector.shape_cast %305 : vector<16xf32> to vector<16x1xf32>
    %cst_74 = arith.constant 3.200000e+01 : f32
    %307 = vector.broadcast %cst_74 : f32 to vector<16x1xf32>
    %308 = arith.divf %306, %307 : vector<16x1xf32>
    %309 = vector.broadcast %308 : vector<16x1xf32> to vector<16x32xf32>
    %310 = arith.subf %304, %309 : vector<16x32xf32>
    %311 = arith.mulf %310, %310 : vector<16x32xf32>
    %cst_75 = arith.constant dense<0.000000e+00> : vector<16xf32>
    %312 = vector.multi_reduction <add>, %311, %cst_75 [1] : vector<16x32xf32> to vector<16xf32>
    %313 = vector.shape_cast %312 : vector<16xf32> to vector<16x1xf32>
    %cst_76 = arith.constant 3.200000e+01 : f32
    %314 = vector.broadcast %cst_76 : f32 to vector<16x1xf32>
    %315 = arith.divf %313, %314 : vector<16x1xf32>
    %316 = vector.broadcast %308 : vector<16x1xf32> to vector<16x32xf32>
    %317 = arith.subf %304, %316 : vector<16x32xf32>
    %cst_77 = arith.constant 9.99999997E-7 : f32
    %318 = vector.broadcast %cst_77 : f32 to vector<16x1xf32>
    %319 = arith.addf %315, %318 : vector<16x1xf32>
    %320 = math.rsqrt %319 : vector<16x1xf32>
    %321 = vector.broadcast %320 : vector<16x1xf32> to vector<16x32xf32>
    %322 = arith.mulf %317, %321 : vector<16x32xf32>
    %323 = vector.broadcast %183 : vector<1x32xf32> to vector<16x32xf32>
    %324 = arith.mulf %322, %323 : vector<16x32xf32>
    %325 = vector.broadcast %184 : vector<1x32xf32> to vector<16x32xf32>
    %326 = arith.addf %324, %325 : vector<16x32xf32>
    %c0_78 = arith.constant 0 : index
    %c0_79 = arith.constant 0 : index
    %327 = vector.load %arg7[%c0_78, %c0_79] : memref<16x32xf32, #tpu.memory_space<vmem>>, vector<16x32xf32>
    tpu.vector_store %arg7[%c0_78, %c0_79], %326 {strides = array<i32>} : memref<16x32xf32, #tpu.memory_space<vmem>>, vector<16x32xf32>,
    return
  }
}

</mosaic_0001>

<bundles_post_ra>
// kernel: tpu_custom_call.1
= control target key start
LH: loop header
LB: loop body
LE: loop exit
PB: predicated region body
PF: predicated region fallthrough
CT: control target
= control target key end

     0   :  { %14 = vsyncpa [#allocation3], 0  ;;  %s5319_s0 = inlined_call_operand.hbm [shape: f32[16,32], index: 0, kind: input, shape index: {}]   ;;  %s5320_s1 = inlined_call_operand.vmem [shape: f32[2,8], index: 1, kind: input, shape index: {}]   ;;  %s5321_s2 = inlined_call_operand.vmem [shape: f32[2,32,96], index: 2, kind: input, shape index: {}]   ;;  %s5322_s3 = inlined_call_operand.vmem [shape: f32[2,32,32], index: 3, kind: input, shape index: {}]   ;;  %s5323_s4 = inlined_call_operand.vmem [shape: f32[2,32,64], index: 4, kind: input, shape index: {}]   ;;  %s5324_s5 = inlined_call_operand.vmem [shape: f32[2,64,32], index: 5, kind: input, shape index: {}]   ;;  %s5325_s6 = inlined_call_operand.vmem [shape: f32[2,8,96], index: 6, kind: input, shape index: {}]   ;;  %s5326_s7 = inlined_call_operand.hbm [shape: f32[16,32], index: 7, kind: output, shape index: {0}]   ;;  %s5327_s8 = inlined_call_operand.hbm [shape: f32[2,8,64], index: 8, kind: output, shape index: {1}]  }
   0x1   :  { %15 = vsyncpa [#allocation4], 0 }
   0x2   :  { %16 = vsyncpa [#allocation7], 0  ;;  %s4499_s27 = smov [#allocation2]   ;;  %s4427_s9 = scalar_lea.hbm %s5319_s0, 256 }
   0x3   :  { %s22_s28 = sshll.u32 %s4499_s27, 4  ;;  %p4428_p0 = scmp.ne.s32.totalorder %s5319_s0, %s4427_s9  ;;  %s23_s28 = int_to_ptr.vmem [resolvable:$true] %s22_s28 }
   0x4   :  { %p4431_p1 = scmp.lt.u32.totalorder %s4427_s9, %s5319_s0 }
   0x6   :  { %p4433_p2 = pnand %p4431_p1, %p4428_p0 }
   0x8   :  { %4436 = shalt.err (!%p4433_p2)
}
   0x9   :  { %s4437_s14 = scalar_lea.vmem %s23_s28, 256  ;;  %p4442_p4 = scmp.lt.s32.totalorder %s23_s28, %s23_s28 }
   0xa   :  { %p4438_p3 = scmp.ne.s32.totalorder %s23_s28, %s4437_s14  ;;  %p4443_p5 = scmp.lt.s32.totalorder %s4437_s14, %s4437_s14 }
   0xc   :  { %p4444_p6 = por %p4443_p5, %p4442_p4 }
   0xe   :  { %p4445_p7 = pnand %p4444_p6, %p4438_p3 }
  0x10   :  { %4448 = shalt.err (!%p4445_p7)
}
  0x11   :  { %s4500_s15 = smov 128   ;;  %s4501_s16 = smov 8  }
  0x12   :  { %28 = dma.hbm_to_vmem [thread:$0]  %s5319_s0, 256, %s23_s28, [#allocation3], %s4500_s15, %s4500_s15, %s4501_s16  }
  0x13   :  { %4493 = dma.done.wait [#allocation3], 256  }
  0x14   :  { %4494 = vsyncadd [#allocation3], 4294967040  ;;  %vm60_vm0 = vcmask 261120   ;;  %v52_v0 = vld [vmem:[%s5321_s2] sm:$0xff]  ;;  %v53_v1 = vld [vmem:[%s5321_s2 + $0x8] sm:$0xff]  ;;  %v56_v8 = vlaneseq  ;;  %v4502_v14 = vmov 0.0  }
  0x15   :  { %v54_v2 = vld [vmem:[%s5321_s2 + $0x10] sm:$0xff]  ;;  %v4250_v3 = vpack.c.bf16 %v53_v1, %v52_v0  ;;  %v55_v4 = vld [vmem:[%s5321_s2 + $0x18] sm:$0xff]  ;;  %v4588_v5 = vld [vmem:[#allocation2] sm:$0xff]  ;;  %4007 = vmatprep.subr.mxu0 %v4502_v14  ;;  %s4503_s28 = smov 56   ;;  %s4504_s29 = smov 104   ;;  %vm4505_vm1 = vmmov 0  }
  0x16   :  { %v4254_v6 = vpack.c.bf16 %v55_v4, %v54_v2  ;;  %3994 = vmatprep.mubr.msk.f32.mxu1 %vm60_vm0, %v4588_v5  ;;  %v4592_v7 = vld [vmem:[#allocation2 + $0x8] sm:$0xff]  ;;  %v4596_v9 = vshrl.u32 %v56_v8, 7  ;;  %v4604_v11 = vld [vmem:[%s5325_s6] sm:$0xff]  ;;  %4009 = vmatprep.mubr.msk.f32.mxu0 %vm4505_vm1, %v4502_v14  ;;  %s4506_s30 = smov 80   ;;  %s4507_s9 = smov 120   ;;  %vm158_vm2 = vcmask 64512  }
  0x17   :  { %4251 = vmatprep.subr.bf16.mxu1 %v4250_v3  ;;  %v46_v32 = vld [vmem:[%s5320_s1] sm:$0x3]  ;;  %s4508_s1 = smov 112   ;;  %s4509_s22 = smov 16   ;;  %vm906_vm3 = vcmask 130048   ;;  %vm908_vm4 = vcmask 195584  }
  0x18   :  { %4253 = vmatpush3.bf16.msra.mxu1 %v4250_v3  ;;  %v4599_v10 = vsub.s32 0, %v4596_v9  ;;  %v47_v33 = vmul.f32 -1e+09, %v46_v32  ;;  %s4510_s23 = smov 24   ;;  %vm917_vm5 = vcmask 523264   ;;  %s4512_s11 = smov 40  }
  0x19   :  { %4255 = vmatprep.subr.bf16.mxu1 %v4254_v6  ;;  %s4513_s12 = smov 48   ;;  %vm911_vm6 = vcmask 326656   ;;  %vm913_vm7 = vcmask 392192   ;;  %vm915_vm8 = vcmask 457728  }
  0x1a   :  { %v59_v12 = vrot.slane %v4604_v11, %v4599_v10  ;;  %v4710_v34 = vrot.slane %v47_v33, %v4599_v10  ;;  %v49_v43 = vrot.slane %v47_v33, 1 }
  0x1c   :  { %4257 = vmatpush3.bf16.msra.mxu1 %v4254_v6  ;;  %v4717_v52 = vrot.slane %v49_v43, %v4599_v10 }
  0x1d   :  { %3997 = vmatprep.subr.mxu1 %v4502_v14 }
  0x1f   :  { %3995 = vmatmul.mubr.msk.f32.vlgmr.msra.gmra.mrb[0].mxu1 %vm60_vm0, %v4592_v7 }
  0x20   :  { %3999 = vmatprep.mubr.msk.f32.mxu1 %vm4505_vm1, %v4502_v14 }
  0xf2   :  { %v3996_v13 = vpop.f32.mrb[0].mxu1 }
  0xf3   :  { %v133_v15 = vpop.f32.mrb[1].mxu1  ;;  %v4620_v17 = vadd.f32 %v3996_v13, %v59_v12 }
  0xf4   :  { %v4610_v16 = vadd.f32 %v133_v15, %v59_v12 }
  0xf6   :  { %147 = vrot.lane.b32.xlu1 %v4610_v16, %s4503_s28  ;;  %143 = vrot.lane.b32.xlu0 %v4610_v16, %s4504_s29 }
  0xfa   :  { %150 = vrot.lane.b32.xlu1 %v4620_v17, %s4504_s29  ;;  %145 = vrot.lane.b32.xlu0 %v4610_v16, %s4506_s30 }
  0xfe   :  { %154 = vrot.lane.b32.xlu1 %v4620_v17, %s4503_s28  ;;  %152 = vrot.lane.b32.xlu0 %v4620_v17, %s4506_s30 }
 0x102   :  { %156 = vrot.lane.b32.xlu0 %v4610_v16, %s4507_s9 }
 0x168   :  { %v4632_v18 = vpop.permute.xlu1 %147  ;;  %v4634_v19 = vpop.permute.xlu0 %143 }
 0x169   :  { %233 = vrot.lane.b32.xlu1 %v4634_v19, %s4507_s9 }
 0x16c   :  { %v4638_v20 = vpop.permute.xlu0 %145  ;;  %v4644_v21 = vpop.permute.xlu1 %150 }
 0x16d   :  { %385 = vrot.lane.b32.xlu1 %v4632_v18, %s4507_s9  ;;  %309 = vrot.lane.b32.xlu0 %v4638_v20, %s4507_s9 }
 0x170   :  { %v4646_v22 = vpop.permute.xlu0 %152  ;;  %v4652_v23 = vpop.permute.xlu1 %154 }
 0x171   :  { %537 = vrot.lane.b32.xlu1 %v4644_v21, %s4507_s9  ;;  %461 = vrot.lane.b32.xlu0 %v4620_v17, %s4507_s9 }
 0x174   :  { %v157_v24 = vpop.permute.xlu0 %156 }
 0x175   :  { %689 = vrot.lane.b32.xlu1 %v4652_v23, %s4507_s9  ;;  %613 = vrot.lane.b32.xlu0 %v4646_v22, %s4507_s9 }
 0x176   :  { %3998 = vmatpush3.xpose.msk.msra.mxu1 %vm158_vm2, %v157_v24 }
 0x177   :  { %4002 = vmatprep.subr.mxu1 %v4502_v14 }
 0x179   :  { %4000 = vmatmul.mubr.msk.f32.vlgmr.msra.gmra.mrb[2].mxu1 %vm158_vm2, %v4610_v16 }
 0x17a   :  { %4004 = vmatprep.mubr.msk.f32.mxu1 %vm4505_vm1, %v4502_v14 }
 0x1db   :  { %v234_v25 = vpop.permute.xlu1 %233 }
 0x1dc   :  { %4003 = vmatpush3.xpose.msk.msra.mxu1 %vm158_vm2, %v234_v25 }
 0x1dd   :  { %4012 = vmatprep.subr.mxu1 %v4502_v14 }
 0x1df   :  { %v386_v26 = vpop.permute.xlu1 %385  ;;  %4005 = vmatmul.mubr.msk.f32.vlgmr.msra.gmra.mrb[4].mxu1 %vm158_vm2, %v4634_v19  ;;  %v310_v27 = vpop.permute.xlu0 %309 }
 0x1e0   :  { %4008 = vmatpush3.xpose.msk.msra.mxu0 %vm158_vm2, %v310_v27  ;;  %4013 = vmatpush3.xpose.msk.msra.mxu1 %vm158_vm2, %v386_v26 }
 0x1e1   :  { %4014 = vmatprep.mubr.msk.f32.mxu1 %vm4505_vm1, %v4502_v14  ;;  %4017 = vmatprep.subr.mxu0 %v4502_v14 }
 0x1e2   :  { %4022 = vmatprep.subr.mxu1 %v4502_v14 }
 0x1e3   :  { %v538_v28 = vpop.permute.xlu1 %537  ;;  %4010 = vmatmul.mubr.msk.f32.vlgmr.msra.gmra.mrb[0].mxu0 %vm158_vm2, %v4638_v20  ;;  %4015 = vmatmul.mubr.msk.f32.vlgmr.msra.gmra.mrb[6].mxu1 %vm158_vm2, %v4632_v18  ;;  %v462_v29 = vpop.permute.xlu0 %461 }
 0x1e4   :  { %4018 = vmatpush3.xpose.msk.msra.mxu0 %vm158_vm2, %v462_v29  ;;  %4023 = vmatpush3.xpose.msk.msra.mxu1 %vm158_vm2, %v538_v28 }
 0x1e5   :  { %4019 = vmatprep.mubr.msk.f32.mxu0 %vm4505_vm1, %v4502_v14  ;;  %4024 = vmatprep.mubr.msk.f32.mxu1 %vm4505_vm1, %v4502_v14 }
 0x1e6   :  { %4027 = vmatprep.subr.mxu0 %v4502_v14  ;;  %4032 = vmatprep.subr.mxu1 %v4502_v14 }
 0x1e7   :  { %v690_v30 = vpop.permute.xlu1 %689  ;;  %4020 = vmatmul.mubr.msk.f32.vlgmr.msra.gmra.mrb[2].mxu0 %vm158_vm2, %v4620_v17  ;;  %4025 = vmatmul.mubr.msk.f32.vlgmr.msra.gmra.mrb[8].mxu1 %vm158_vm2, %v4644_v21  ;;  %v614_v31 = vpop.permute.xlu0 %613 }
 0x1e8   :  { %4028 = vmatpush3.xpose.msk.msra.mxu0 %vm158_vm2, %v614_v31  ;;  %4033 = vmatpush3.xpose.msk.msra.mxu1 %vm158_vm2, %v690_v30 }
 0x1e9   :  { %4029 = vmatprep.mubr.msk.f32.mxu0 %vm4505_vm1, %v4502_v14  ;;  %4034 = vmatprep.mubr.msk.f32.mxu1 %vm4505_vm1, %v4502_v14 }
 0x1ea   :  { %4037 = vmatprep.subr.mxu0 %v4502_v14  ;;  %4042 = vmatprep.subr.mxu1 %v4502_v14 }
 0x1eb   :  { %4030 = vmatmul.mubr.msk.f32.vlgmr.msra.gmra.mrb[4].mxu0 %vm158_vm2, %v4646_v22  ;;  %4035 = vmatmul.mubr.msk.f32.vlgmr.msra.gmra.mrb[10].mxu1 %vm158_vm2, %v4652_v23 }
 0x1ec   :  { %4039 = vmatprep.mubr.msk.f32.mxu0 %vm4505_vm1, %v4502_v14  ;;  %4044 = vmatprep.mubr.msk.f32.mxu1 %vm4505_vm1, %v4502_v14 }
 0x24c   :  { %v229_v35 = vpop.f32.mrb[2].mxu1 }
 0x24d   :  { %v765_v36 = vmul.f32 0.35355338, %v229_v35  ;;  %v4001_v37 = vpop.f32.mrb[3].mxu1 }
 0x24f   :  { %v781_v38 = vadd.f32 %v4710_v34, %v765_v36 }
 0x251   :  { %v789_v39 = vsel %vm158_vm2, %v781_v38, -inf }
 0x252   :  { %790 = vmax.xlane.f32.xlu0 %v789_v39 }
 0x2b2   :  { %v305_v40 = vpop.f32.mrb[4].mxu1 }
 0x2b3   :  { %v766_v41 = vmul.f32 0.35355338, %v305_v40  ;;  %v4006_v42 = vpop.f32.mrb[5].mxu1 }
 0x2b5   :  { %v782_v44 = vadd.f32 %v4710_v34, %v766_v41 }
 0x2b6   :  { %v381_v45 = vpop.f32.mrb[0].mxu0  ;;  %v457_v46 = vpop.f32.mrb[6].mxu1 }
 0x2b7   :  { %v767_v47 = vmul.f32 0.35355338, %v381_v45  ;;  %v4011_v48 = vpop.f32.mrb[1].mxu0  ;;  %v4016_v49 = vpop.f32.mrb[7].mxu1  ;;  %v768_v50 = vmul.f32 0.35355338, %v457_v46 }
 0x2b8   :  { %v792_v51 = vsel %vm158_vm2, %v782_v44, -inf }
 0x2b9   :  { %793 = vmax.xlane.f32.xlu1 %v792_v51  ;;  %v783_v53 = vadd.f32 %v4710_v34, %v767_v47  ;;  %v784_v61 = vadd.f32 %v4710_v34, %v768_v50 }
 0x2ba   :  { %v533_v54 = vpop.f32.mrb[2].mxu0  ;;  %v609_v55 = vpop.f32.mrb[8].mxu1 }
 0x2bb   :  { %v769_v56 = vmul.f32 0.35355338, %v533_v54  ;;  %v4021_v57 = vpop.f32.mrb[3].mxu0  ;;  %v4026_v58 = vpop.f32.mrb[9].mxu1  ;;  %v770_v59 = vmul.f32 0.35355338, %v609_v55 }
 0x2bc   :  { %v795_v60 = vsel %vm158_vm2, %v783_v53, -inf  ;;  %v798_v6 = vsel %vm158_vm2, %v784_v61, -inf }
 0x2bd   :  { %796 = vmax.xlane.f32.xlu0 %v795_v60  ;;  %v785_v62 = vadd.f32 %v4717_v52, %v769_v56  ;;  %v786_v12 = vadd.f32 %v4717_v52, %v770_v59 }
 0x2be   :  { %v685_v63 = vpop.f32.mrb[4].mxu0  ;;  %v761_v0 = vpop.f32.mrb[10].mxu1 }
 0x2bf   :  { %v771_v1 = vmul.f32 0.35355338, %v685_v63  ;;  %v4031_v2 = vpop.f32.mrb[5].mxu0  ;;  %v4036_v3 = vpop.f32.mrb[11].mxu1  ;;  %v772_v4 = vmul.f32 0.35355338, %v761_v0 }
 0x2c0   :  { %v801_v8 = vsel %vm158_vm2, %v785_v62, -inf  ;;  %v804_v24 = vsel %vm158_vm2, %v786_v12, -inf }
 0x2c1   :  { %799 = vmax.xlane.f32.xlu0 %v798_v6  ;;  %802 = vmax.xlane.f32.xlu1 %v801_v8  ;;  %v787_v13 = vadd.f32 %v4717_v52, %v771_v1  ;;  %v788_v25 = vadd.f32 %v4717_v52, %v772_v4 }
 0x2c3   :  { %v807_v15 = vsel %vm158_vm2, %v787_v13, -inf  ;;  %v810_v26 = vsel %vm158_vm2, %v788_v25, -inf }
 0x2c5   :  { %805 = vmax.xlane.f32.xlu0 %v804_v24  ;;  %808 = vmax.xlane.f32.xlu1 %v807_v15 }
 0x2c9   :  { %811 = vmax.xlane.f32.xlu0 %v810_v26 }
 0x2d6   :  { %919 = vrot.lane.b32.xlu1 %v4610_v16, %s4508_s1 }
 0x2da   :  { %1070 = vrot.lane.b32.xlu1 %v4638_v20, %s4508_s1 }
 0x2de   :  { %1145 = vrot.lane.b32.xlu1 %v4632_v18, %s4508_s1 }
 0x2df   :  { %995 = vrot.lane.b32.xlu0 %v4634_v19, %s4508_s1  ;;  %v791_v27 = vpop.xlane.xlu0 %790 }
 0x2e0   :  { %v813_v28 = vsub.f32 %v781_v38, %v791_v27 }
 0x2e2   :  { %1295 = vrot.lane.b32.xlu1 %v4644_v21, %s4508_s1  ;;  %v821_v29 = vmul.f32 1.442695, %v813_v28 }
 0x2e3   :  { %1220 = vrot.lane.b32.xlu0 %v4620_v17, %s4508_s1 }
 0x2e4   :  { %4347 = vpow2.f32 %v821_v29 }
 0x2ee   :  { %v4743_v16 = vpop.eup %4347 }
 0x2ef   :  { %v837_v20 = vsel %vm158_vm2, %v4743_v16, 0.0 }
 0x306   :  { %838 = vadd.xlane.f32.xlu1 %v837_v20 }
 0x346   :  { %v794_v18 = vpop.xlane.xlu1 %793 }
 0x347   :  { %v814_v30 = vsub.f32 %v782_v44, %v794_v18 }
 0x349   :  { %v823_v31 = vmul.f32 1.442695, %v814_v30 }
 0x34a   :  { %v797_v19 = vpop.xlane.xlu0 %796 }
 0x34b   :  { %4349 = vpow2.f32 %v823_v31  ;;  %v815_v32 = vsub.f32 %v783_v53, %v797_v19 }
 0x34d   :  { %v825_v21 = vmul.f32 1.442695, %v815_v32 }
 0x34e   :  { %v803_v33 = vpop.xlane.xlu1 %802  ;;  %v800_v35 = vpop.xlane.xlu0 %799 }
 0x34f   :  { %4351 = vpow2.f32 %v825_v21  ;;  %v817_v17 = vsub.f32 %v785_v62, %v803_v33  ;;  %v816_v36 = vsub.f32 %v784_v61, %v800_v35 }
 0x351   :  { %v829_v37 = vmul.f32 1.442695, %v817_v17  ;;  %v827_v38 = vmul.f32 1.442695, %v816_v36 }
 0x352   :  { %v809_v39 = vpop.xlane.xlu1 %808  ;;  %v806_v40 = vpop.xlane.xlu0 %805 }
 0x353   :  { %4353 = vpow2.f32 %v829_v37  ;;  %v819_v41 = vsub.f32 %v787_v13, %v809_v39  ;;  %v818_v42 = vsub.f32 %v786_v12, %v806_v40  ;;  %v1550_v40 = vld [vmem:[%s5322_s3] sm:$0xff] }
 0x354   :  { %4355 = vpow2.f32 %v827_v38 }
 0x355   :  { %v4350_v43 = vpop.eup %4349  ;;  %v833_v44 = vmul.f32 1.442695, %v819_v41  ;;  %v831_v45 = vmul.f32 1.442695, %v818_v42  ;;  %v1551_v41 = vld [vmem:[%s5322_s3 + $0x8] sm:$0xff] }
 0x356   :  { %v920_v46 = vpop.permute.xlu1 %919  ;;  %v812_v47 = vpop.xlane.xlu0 %811  ;;  %v840_v48 = vsel %vm158_vm2, %v4350_v43, 0.0  ;;  %v4258_v42 = vpack.c.bf16 %v1551_v41, %v1550_v40 }
 0x357   :  { %4357 = vpow2.f32 %v833_v44  ;;  %v820_v49 = vsub.f32 %v788_v25, %v812_v47  ;;  %841 = vadd.xlane.f32.xlu0 %v840_v48  ;;  %4038 = vmatpush3.msra.mxu0 %v920_v46  ;;  %v1553_v46 = vld [vmem:[%s5322_s3 + $0x18] sm:$0xff] }
 0x358   :  { %4359 = vpow2.f32 %v831_v45  ;;  %4047 = vmatprep.subr.mxu0 %v4502_v14  ;;  %v1552_v45 = vld [vmem:[%s5322_s3 + $0x10] sm:$0xff] }
 0x359   :  { %v4352_v50 = vpop.eup %4351  ;;  %v835_v51 = vmul.f32 1.442695, %v820_v49  ;;  %v4262_v47 = vpack.c.bf16 %v1553_v46, %v1552_v45  ;;  %v1682_v45 = vld [vmem:[%s5323_s4 + $0x10] sm:$0xff]  ;;  %v1683_v46 = vld [vmem:[%s5323_s4 + $0x18] sm:$0xff] }
 0x35a   :  { %v996_v53 = vpop.permute.xlu0 %995  ;;  %v843_v54 = vsel %vm158_vm2, %v4352_v50, 0.0  ;;  %v1071_v1 = vpop.permute.xlu1 %1070 }
 0x35b   :  { %4361 = vpow2.f32 %v835_v51  ;;  %844 = vadd.xlane.f32.xlu1 %v843_v54  ;;  %4043 = vmatpush3.msra.mxu1 %v996_v53 }
 0x35c   :  { %4052 = vmatprep.subr.mxu1 %v4502_v14 }
 0x35d   :  { %v4354_v55 = vpop.eup %4353 }
 0x35e   :  { %v4356_v56 = vpop.eup %4355  ;;  %v849_v57 = vsel %vm158_vm2, %v4354_v55, 0.0  ;;  %v1146_v2 = vpop.permute.xlu1 %1145 }
 0x35f   :  { %850 = vadd.xlane.f32.xlu1 %v849_v57  ;;  %v846_v58 = vsel %vm158_vm2, %v4356_v56, 0.0 }
 0x360   :  { %847 = vadd.xlane.f32.xlu0 %v846_v58 }
 0x361   :  { %v4358_v59 = vpop.eup %4357 }
 0x362   :  { %v4360_v60 = vpop.eup %4359  ;;  %v855_v61 = vsel %vm158_vm2, %v4358_v59, 0.0  ;;  %v1296_v3 = vpop.permute.xlu1 %1295 }
 0x363   :  { %856 = vadd.xlane.f32.xlu1 %v855_v61  ;;  %v852_v62 = vsel %vm158_vm2, %v4360_v60, 0.0 }
 0x364   :  { %853 = vadd.xlane.f32.xlu0 %v852_v62 }
 0x365   :  { %v4755_v63 = vpop.eup %4361 }
 0x366   :  { %v858_v0 = vsel %vm158_vm2, %v4755_v63, 0.0 }
 0x368   :  { %859 = vadd.xlane.f32.xlu0 %v858_v0 }
 0x374   :  { %1445 = vrot.lane.b32.xlu1 %v4652_v23, %s4508_s1  ;;  %v1221_v23 = vpop.permute.xlu0 %1220 }
 0x37e   :  { %1370 = vrot.lane.b32.xlu0 %v4646_v22, %s4508_s1 }
 0x393   :  { %v839_v4 = vpop.xlane.xlu1 %838 }
 0x394   :  { %4363 = vrcp.f32 %v839_v4 }
 0x39e   :  { %v4364_v6 = vpop.eup %4363 }
 0x39f   :  { %v4764_v8 = vmul.f32 %v4364_v6, %v4743_v16 }
 0x3a1   :  { %4040 = vmatmul.mubr.msk.f32.vlgmr.msra.gmra.mrb[6].mxu0 %vm158_vm2, %v4764_v8 }
 0x3a2   :  { %4048 = vmatpush3.msra.mxu0 %v1071_v1  ;;  %4049 = vmatprep.mubr.msk.f32.mxu0 %vm4505_vm1, %v4502_v14 }
 0x3a3   :  { %4057 = vmatprep.subr.mxu0 %v4502_v14 }
 0x3e4   :  { %v842_v22 = vpop.xlane.xlu0 %841 }
 0x3e5   :  { %4365 = vrcp.f32 %v842_v22 }
 0x3e8   :  { %v845_v12 = vpop.xlane.xlu1 %844 }
 0x3e9   :  { %4367 = vrcp.f32 %v845_v12 }
 0x3ec   :  { %v851_v13 = vpop.xlane.xlu1 %850 }
 0x3ed   :  { %4369 = vrcp.f32 %v851_v13  ;;  %v848_v15 = vpop.xlane.xlu0 %847  ;;  %v1556_v13 = vsub.s32 1, %v4596_v9 }
 0x3ee   :  { %4371 = vrcp.f32 %v848_v15 }
 0x3ef   :  { %v4366_v24 = vpop.eup %4365  ;;  %v1557_v15 = vrot.slane %v4604_v11, %v1556_v13 }
 0x3f0   :  { %v4771_v25 = vmul.f32 %v4366_v24, %v4350_v43  ;;  %v857_v26 = vpop.xlane.xlu1 %856 }
 0x3f1   :  { %4373 = vrcp.f32 %v857_v26  ;;  %v854_v27 = vpop.xlane.xlu0 %853 }
 0x3f2   :  { %4375 = vrcp.f32 %v854_v27  ;;  %4045 = vmatmul.mubr.msk.f32.vlgmr.msra.gmra.mrb[12].mxu1 %vm158_vm2, %v4771_v25 }
 0x3f3   :  { %v4368_v28 = vpop.eup %4367  ;;  %4053 = vmatpush3.msra.mxu1 %v1146_v2  ;;  %4054 = vmatprep.mubr.msk.f32.mxu1 %vm4505_vm1, %v4502_v14 }
 0x3f4   :  { %v4777_v29 = vmul.f32 %v4368_v28, %v4352_v50  ;;  %4062 = vmatprep.subr.mxu1 %v4502_v14  ;;  %v1446_v17 = vpop.permute.xlu1 %1445 }
 0x3f5   :  { %v860_v16 = vpop.xlane.xlu0 %859 }
 0x3f6   :  { %4377 = vrcp.f32 %v860_v16  ;;  %4050 = vmatmul.mubr.msk.f32.vlgmr.msra.gmra.mrb[8].mxu0 %vm158_vm2, %v4777_v29 }
 0x3f7   :  { %v4370_v20 = vpop.eup %4369  ;;  %4058 = vmatpush3.msra.mxu0 %v1221_v23  ;;  %4059 = vmatprep.mubr.msk.f32.mxu0 %vm4505_vm1, %v4502_v14 }
 0x3f8   :  { %v4372_v18 = vpop.eup %4371  ;;  %v4784_v30 = vmul.f32 %v4370_v20, %v4354_v55  ;;  %4067 = vmatprep.subr.mxu0 %v4502_v14 }
 0x3f9   :  { %v4787_v31 = vmul.f32 %v4372_v18, %v4356_v56  ;;  %v1371_v19 = vpop.permute.xlu0 %1370 }
 0x3fa   :  { %4060 = vmatmul.mubr.msk.f32.vlgmr.msra.gmra.mrb[10].mxu0 %vm158_vm2, %v4784_v30 }
 0x3fb   :  { %v4374_v32 = vpop.eup %4373  ;;  %4055 = vmatmul.mubr.msk.f32.vlgmr.msra.gmra.mrb[14].mxu1 %vm158_vm2, %v4787_v31  ;;  %4068 = vmatpush3.msra.mxu0 %v1371_v19 }
 0x3fc   :  { %v4376_v21 = vpop.eup %4375  ;;  %v4793_v33 = vmul.f32 %v4374_v32, %v4358_v59  ;;  %4063 = vmatpush3.msra.mxu1 %v1296_v3  ;;  %4064 = vmatprep.mubr.msk.f32.mxu1 %vm4505_vm1, %v4502_v14 }
 0x3fd   :  { %v4797_v35 = vmul.f32 %v4376_v21, %v4360_v60  ;;  %4069 = vmatprep.mubr.msk.f32.mxu0 %vm4505_vm1, %v4502_v14  ;;  %4072 = vmatprep.subr.mxu1 %v4502_v14 }
 0x3fe   :  { %4070 = vmatmul.mubr.msk.f32.vlgmr.msra.gmra.mrb[12].mxu0 %vm158_vm2, %v4793_v33  ;;  %4259 = vmatprep.subr.bf16.mxu0 %v4258_v42 }
 0x3ff   :  { %4065 = vmatmul.mubr.msk.f32.vlgmr.msra.gmra.mrb[16].mxu1 %vm158_vm2, %v4797_v35  ;;  %4261 = vmatpush3.bf16.msra.mxu0 %v4258_v42 }
 0x400   :  { %v4378_v36 = vpop.eup %4377  ;;  %4073 = vmatpush3.msra.mxu1 %v1446_v17  ;;  %4074 = vmatprep.mubr.msk.f32.mxu1 %vm4505_vm1, %v4502_v14 }
 0x401   :  { %v4809_v37 = vmul.f32 %v4378_v36, %v4755_v63  ;;  %4263 = vmatprep.subr.bf16.mxu0 %v4262_v47 }
 0x403   :  { %4075 = vmatmul.mubr.msk.f32.vlgmr.msra.gmra.mrb[18].mxu1 %vm158_vm2, %v4809_v37  ;;  %4265 = vmatpush3.bf16.msra.mxu0 %v4262_v47  ;;  %v4270_v47 = vpack.c.bf16 %v1683_v46, %v1682_v45 }
 0x474   :  { %v991_v38 = vpop.f32.mrb[6].mxu0 }
 0x475   :  { %v4041_v39 = vpop.f32.mrb[7].mxu0 }
 0x4c5   :  { %v1066_v43 = vpop.f32.mrb[12].mxu1 }
 0x4c6   :  { %1521 = vrot.lane.b32.xlu0 %v1066_v43, %s4501_s16  ;;  %v4046_v44 = vpop.f32.mrb[13].mxu1  ;;  %v1681_v43 = vld [vmem:[%s5323_s4 + $0x8] sm:$0xff] }
 0x4c9   :  { %v1141_v48 = vpop.f32.mrb[8].mxu0 }
 0x4ca   :  { %1525 = vrot.lane.b32.xlu1 %v1141_v48, %s4509_s22  ;;  %v4051_v49 = vpop.f32.mrb[9].mxu0  ;;  %v1771_v48 = vld [vmem:[%s5324_s5] sm:$0xff] }
 0x4cb   :  { %v1772_v49 = vld [vmem:[%s5324_s5 + $0x8] sm:$0xff] }
 0x4cd   :  { %v1291_v50 = vpop.f32.mrb[10].mxu0 }
 0x4ce   :  { %v1216_v51 = vpop.f32.mrb[14].mxu1  ;;  %v4061_v53 = vpop.f32.mrb[11].mxu0 }
 0x4cf   :  { %1529 = vrot.lane.b32.xlu1 %v1216_v51, %s4510_s23  ;;  %v4056_v54 = vpop.f32.mrb[15].mxu1  ;;  %v4274_v51 = vpack.c.bf16 %v1772_v49, %v1771_v48  ;;  %v1774_v53 = vld [vmem:[%s5324_s5 + $0x18] sm:$0xff] }
 0x4d1   :  { %v1441_v55 = vpop.f32.mrb[12].mxu0  ;;  %4275 = vmatprep.subr.bf16.mxu0 %v4274_v51 }
 0x4d2   :  { %v1366_v56 = vpop.f32.mrb[16].mxu1  ;;  %v4071_v57 = vpop.f32.mrb[13].mxu0 }
 0x4d3   :  { %1536 = vrot.lane.b32.xlu0 %v1366_v56, %s4501_s16  ;;  %v4066_v58 = vpop.f32.mrb[17].mxu1  ;;  %v1776_v56 = vld [vmem:[%s5324_s5 + $0x28] sm:$0xff] }
 0x4d6   :  { %v1516_v59 = vpop.f32.mrb[18].mxu1 }
 0x4d7   :  { %1544 = vrot.lane.b32.xlu1 %v1516_v59, %s4510_s23  ;;  %v4076_v60 = vpop.f32.mrb[19].mxu1  ;;  %1540 = vrot.lane.b32.xlu0 %v1441_v55, %s4509_s22  ;;  %v1775_v55 = vld [vmem:[%s5324_s5 + $0x20] sm:$0xff] }
 0x4d8   :  { %v4282_v57 = vpack.c.bf16 %v1776_v56, %v1775_v55 }
 0x538   :  { %v1522_v62 = vpop.permute.xlu0 %1521 }
 0x539   :  { %v1532_v63 = vsel %vm158_vm2, %v991_v38, %v1522_v62 }
 0x53c   :  { %v1526_v61 = vpop.permute.xlu1 %1525 }
 0x53d   :  { %v1533_v0 = vsel %vm906_vm3, %v1532_v63, %v1526_v61 }
 0x541   :  { %v1530_v1 = vpop.permute.xlu1 %1529 }
 0x542   :  { %v1534_v2 = vsel %vm908_vm4, %v1533_v0, %v1530_v1  ;;  %v1670_v0 = vsub.s32 4, %v4596_v9  ;;  %v1676_v1 = vsub.s32 5, %v4596_v9 }
 0x543   :  { %4085 = vmatprep.mubr.msk.f32.mxu0 %vm60_vm0, %v1534_v2 }
 0x544   :  { %v1671_v2 = vrot.slane %v4604_v11, %v1670_v0 }
 0x545   :  { %v1537_v3 = vpop.permute.xlu0 %1536 }
 0x546   :  { %v1547_v4 = vsel %vm158_vm2, %v1291_v50, %v1537_v3  ;;  %v1773_v50 = vld [vmem:[%s5324_s5 + $0x10] sm:$0xff] }
 0x547   :  { %v4278_v54 = vpack.c.bf16 %v1774_v53, %v1773_v50 }
 0x549   :  { %v1545_v6 = vpop.permute.xlu1 %1544  ;;  %v1541_v23 = vpop.permute.xlu0 %1540 }
 0x54a   :  { %v1548_v22 = vsel %vm906_vm3, %v1547_v4, %v1541_v23 }
 0x54b   :  { %v1549_v12 = vsel %vm908_vm4, %v1548_v22, %v1545_v6  ;;  %v1677_v6 = vrot.slane %v4604_v11, %v1676_v1 }
 0x54c   :  { %4086 = vmatmul.mubr.msk.f32.vlgmr.msra.gmra.mrb[14].mxu0 %vm60_vm0, %v1549_v12 }
 0x54d   :  { %4277 = vmatpush3.bf16.msra.mxu0 %v4274_v51 }
 0x54e   :  { %4279 = vmatprep.subr.bf16.mxu0 %v4278_v54 }
 0x551   :  { %4281 = vmatpush3.bf16.msra.mxu0 %v4278_v54 }
 0x552   :  { %4283 = vmatprep.subr.bf16.mxu0 %v4282_v57 }
 0x555   :  { %4285 = vmatpush3.bf16.msra.mxu0 %v4282_v57 }
 0x61f   :  { %v4087_v24 = vpop.f32.mrb[14].mxu0 }
 0x620   :  { %v1636_v26 = vadd.f32 %v4087_v24, %v1557_v15  ;;  %v1630_v27 = vpop.f32.mrb[15].mxu0 }
 0x621   :  { %v1631_v28 = vadd.f32 %v1630_v27, %v1557_v15  ;;  %v1777_v27 = vld [vmem:[%s5324_s5 + $0x30] sm:$0xff] }
 0x622   :  { %v1640_v16 = vadd.f32 %v1636_v26, %v4592_v7 }
 0x623   :  { %v1639_v20 = vadd.f32 %v1631_v28, %v4588_v5  ;;  %v1680_v5 = vld [vmem:[%s5323_s4] sm:$0xff]  ;;  %v1778_v28 = vld [vmem:[%s5324_s5 + $0x38] sm:$0xff] }
 0x624   :  { %v1644_v18 = vsel %vm60_vm0, %v1640_v16, 0.0  ;;  %v4266_v44 = vpack.c.bf16 %v1681_v43, %v1680_v5 }
 0x625   :  { %1645 = vadd.xlane.f32.xlu1 %v1644_v18  ;;  %v1641_v19 = vsel %vm60_vm0, %v1639_v20, 0.0 }
 0x626   :  { %1642 = vadd.xlane.f32.xlu0 %v1641_v19  ;;  %4267 = vmatprep.subr.bf16.mxu1 %v4266_v44 }
 0x627   :  { %4269 = vmatpush3.bf16.msra.mxu1 %v4266_v44 }
 0x628   :  { %4271 = vmatprep.subr.bf16.mxu1 %v4270_v47 }
 0x62b   :  { %4273 = vmatpush3.bf16.msra.mxu1 %v4270_v47 }
 0x6b2   :  { %v1646_v32 = vpop.xlane.xlu1 %1645 }
 0x6b3   :  { %v1649_v21 = vmul.f32 0.03125, %v1646_v32  ;;  %v1643_v17 = vpop.xlane.xlu0 %1642 }
 0x6b4   :  { %v1648_v36 = vmul.f32 0.03125, %v1643_v17 }
 0x6b5   :  { %v1651_v38 = vsub.f32 %v1640_v16, %v1649_v21  ;;  %v4286_v16 = vpack.c.bf16 %v1778_v28, %v1777_v27 }
 0x6b6   :  { %v1650_v39 = vsub.f32 %v1639_v20, %v1648_v36  ;;  %v1686_v20 = vsub.s32 2, %v4596_v9 }
 0x6b7   :  { %v1653_v42 = vmul.f32 %v1651_v38, %v1651_v38  ;;  %4287 = vmatprep.subr.bf16.mxu0 %v4286_v16 }
 0x6b8   :  { %v1652_v40 = vmul.f32 %v1650_v39, %v1650_v39  ;;  %4289 = vmatpush3.bf16.msra.mxu0 %v4286_v16  ;;  %v1687_v18 = vrot.slane %v4604_v11, %v1686_v20 }
 0x6b9   :  { %v1657_v7 = vsel %vm60_vm0, %v1653_v42, 0.0  ;;  %4139 = vmatprep.subr.mxu0 %v4502_v14 }
 0x6ba   :  { %v1654_v41 = vsel %vm60_vm0, %v1652_v40, 0.0 }
 0x6bb   :  { %1655 = vadd.xlane.f32.xlu0 %v1654_v41 }
 0x6bf   :  { %1658 = vadd.xlane.f32.xlu0 %v1657_v7 }
 0x748   :  { %v1656_v58 = vpop.xlane.xlu0 %1655 }
 0x749   :  { %v1660_v59 = vmul.f32 0.03125, %v1656_v58  ;;  %v3814_v58 = vld [vmem:[%s5321_s2 + $0x20] sm:$0xff] }
 0x74b   :  { %v1662_v60 = vadd.f32 1e-06, %v1660_v59  ;;  %v3815_v59 = vld [vmem:[%s5321_s2 + $0x28] sm:$0xff] }
 0x74c   :  { %v1659_v61 = vpop.xlane.xlu0 %1658 }
 0x74d   :  { %4379 = vrsqrt.f32 %v1662_v60  ;;  %v1661_v62 = vmul.f32 0.03125, %v1659_v61  ;;  %v4290_v60 = vpack.c.bf16 %v3815_v59, %v3814_v58  ;;  %v3816_v61 = vld [vmem:[%s5321_s2 + $0x30] sm:$0xff] }
 0x74f   :  { %v1663_v63 = vadd.f32 1e-06, %v1661_v62  ;;  %v3817_v62 = vld [vmem:[%s5321_s2 + $0x38] sm:$0xff]  ;;  %4291 = vmatprep.subr.bf16.mxu1 %v4290_v60 }
 0x751   :  { %4381 = vrsqrt.f32 %v1663_v63  ;;  %v4294_v63 = vpack.c.bf16 %v3817_v62, %v3816_v61 }
 0x757   :  { %v4380_v3 = vpop.eup %4379 }
 0x758   :  { %v1666_v4 = vmul.f32 %v4380_v3, %v1650_v39  ;;  %v1781_v39 = vsub.s32 3, %v4596_v9 }
 0x75a   :  { %v1672_v23 = vmul.f32 %v1671_v2, %v1666_v4  ;;  %v1782_v40 = vrot.slane %v4604_v11, %v1781_v39 }
 0x75b   :  { %v4382_v22 = vpop.eup %4381 }
 0x75c   :  { %v1667_v12 = vmul.f32 %v4382_v22, %v1651_v38  ;;  %v1678_v15 = vadd.f32 %v1677_v6, %v1672_v23 }
 0x75e   :  { %v1673_v24 = vmul.f32 %v1671_v2, %v1667_v12  ;;  %4096 = vmatprep.mubr.msk.f32.mxu1 %vm60_vm0, %v1678_v15  ;;  %v1894_v12 = vsub.s32 6, %v4596_v9 }
 0x760   :  { %v1679_v26 = vadd.f32 %v1677_v6, %v1673_v24  ;;  %v1895_v24 = vrot.slane %v4604_v11, %v1894_v12 }
 0x762   :  { %4097 = vmatmul.mubr.msk.f32.vlgmr.msra.gmra.mrb[20].mxu1 %vm60_vm0, %v1679_v26 }
 0x763   :  { %4293 = vmatpush3.bf16.msra.mxu1 %v4290_v60 }
 0x764   :  { %4295 = vmatprep.subr.bf16.mxu1 %v4294_v63 }
 0x767   :  { %4297 = vmatpush3.bf16.msra.mxu1 %v4294_v63 }
 0x768   :  { %4129 = vmatprep.subr.mxu1 %v4502_v14 }
 0x835   :  { %v4098_v19 = vpop.f32.mrb[20].mxu1 }
 0x836   :  { %v1766_v32 = vadd.f32 %v4098_v19, %v1687_v18  ;;  %v1760_v21 = vpop.f32.mrb[21].mxu1 }
 0x837   :  { %v1761_v17 = vadd.f32 %v1760_v21, %v1687_v18 }
 0x838   :  { %v1770_v38 = vmax.f32 %v1766_v32, 0.0 }
 0x839   :  { %v1769_v36 = vmax.f32 %v1761_v17, 0.0 }
 0x83b   :  { %4115 = vmatprep.mubr.msk.f32.mxu0 %vm917_vm5, %v1769_v36  ;;  %v4946_v36 = vld [vmem:[%s5325_s6 + $0x8] sm:$0xff] }
 0x83c   :  { %4116 = vmatmul.mubr.msk.f32.vlgmr.msra.gmra.mrb[16].mxu0 %vm917_vm5, %v1770_v38 }
 0x83d   :  { %4141 = vmatprep.mubr.msk.f32.mxu0 %vm4505_vm1, %v4502_v14 }
 0x90f   :  { %v4117_v41 = vpop.f32.mrb[16].mxu0 }
 0x910   :  { %v1861_v42 = vadd.f32 %v4117_v41, %v1782_v40  ;;  %v1855_v7 = vpop.f32.mrb[17].mxu0 }
 0x911   :  { %v1856_v5 = vadd.f32 %v1855_v7, %v1782_v40 }
 0x912   :  { %v1865_v43 = vadd.f32 %v1861_v42, %v1679_v26 }
 0x913   :  { %v1864_v44 = vadd.f32 %v1856_v5, %v1678_v15  ;;  %v1900_v15 = vsub.s32 7, %v4596_v9 }
 0x914   :  { %v1869_v45 = vsel %vm60_vm0, %v1865_v43, 0.0 }
 0x915   :  { %1870 = vadd.xlane.f32.xlu0 %v1869_v45  ;;  %v1866_v46 = vsel %vm60_vm0, %v1864_v44, 0.0  ;;  %v1901_v18 = vrot.slane %v4604_v11, %v1900_v15  ;;  %v1914_v11 = vrot.slane %v4946_v36, %v4599_v10 }
 0x916   :  { %1867 = vadd.xlane.f32.xlu1 %v1866_v46 }
 0x9a2   :  { %v1871_v47 = vpop.xlane.xlu0 %1870 }
 0x9a3   :  { %v1873_v48 = vmul.f32 0.03125, %v1871_v47  ;;  %v1868_v49 = vpop.xlane.xlu1 %1867 }
 0x9a4   :  { %v1872_v50 = vmul.f32 0.03125, %v1868_v49 }
 0x9a5   :  { %v1875_v51 = vsub.f32 %v1865_v43, %v1873_v48 }
 0x9a6   :  { %v1874_v53 = vsub.f32 %v1864_v44, %v1872_v50 }
 0x9a7   :  { %v1877_v54 = vmul.f32 %v1875_v51, %v1875_v51 }
 0x9a8   :  { %v1876_v55 = vmul.f32 %v1874_v53, %v1874_v53 }
 0x9a9   :  { %v1881_v56 = vsel %vm60_vm0, %v1877_v54, 0.0 }
 0x9aa   :  { %1882 = vadd.xlane.f32.xlu0 %v1881_v56  ;;  %v1878_v57 = vsel %vm60_vm0, %v1876_v55, 0.0 }
 0x9ab   :  { %1879 = vadd.xlane.f32.xlu1 %v1878_v57 }
 0xa37   :  { %v1883_v2 = vpop.xlane.xlu0 %1882 }
 0xa38   :  { %v1885_v3 = vmul.f32 0.03125, %v1883_v2  ;;  %v1880_v4 = vpop.xlane.xlu1 %1879 }
 0xa39   :  { %v1884_v6 = vmul.f32 0.03125, %v1880_v4 }
 0xa3a   :  { %v1887_v23 = vadd.f32 1e-06, %v1885_v3 }
 0xa3b   :  { %v1886_v22 = vadd.f32 1e-06, %v1884_v6 }
 0xa3c   :  { %4383 = vrsqrt.f32 %v1887_v23 }
 0xa3d   :  { %4385 = vrsqrt.f32 %v1886_v22 }
 0xa46   :  { %v4384_v26 = vpop.eup %4383 }
 0xa47   :  { %v4386_v27 = vpop.eup %4385  ;;  %v1891_v28 = vmul.f32 %v4384_v26, %v1875_v51 }
 0xa48   :  { %v1890_v16 = vmul.f32 %v4386_v27, %v1874_v53 }
 0xa49   :  { %v1897_v19 = vmul.f32 %v1895_v24, %v1891_v28 }
 0xa4a   :  { %v1896_v32 = vmul.f32 %v1895_v24, %v1890_v16 }
 0xa4b   :  { %v4935_v17 = vadd.f32 %v1901_v18, %v1897_v19 }
 0xa4c   :  { %v4933_v21 = vadd.f32 %v1901_v18, %v1896_v32 }
 0xa4e   :  { %4126 = vmatprep.mubr.msk.f32.mxu1 %vm60_vm0, %v4933_v21 }
 0xa4f   :  { %4127 = vmatmul.mubr.msk.f32.vlgmr.msra.gmra.mrb[22].mxu1 %vm60_vm0, %v4935_v17 }
 0xa50   :  { %4131 = vmatprep.mubr.msk.f32.mxu1 %vm4505_vm1, %v4502_v14 }
 0xb22   :  { %v4128_v38 = vpop.f32.mrb[22].mxu1 }
 0xb23   :  { %v1987_v40 = vpop.f32.mrb[23].mxu1  ;;  %v4956_v42 = vadd.f32 %v4128_v38, %v1914_v11 }
 0xb24   :  { %v4950_v41 = vadd.f32 %v1987_v40, %v1914_v11 }
 0xb26   :  { %1999 = vrot.lane.b32.xlu0 %v4950_v41, %s4506_s30  ;;  %1997 = vrot.lane.b32.xlu1 %v4950_v41, %s4504_s29 }
 0xb2a   :  { %2006 = vrot.lane.b32.xlu0 %v4956_v42, %s4506_s30  ;;  %2001 = vrot.lane.b32.xlu1 %v4950_v41, %s4503_s28 }
 0xb2e   :  { %2010 = vrot.lane.b32.xlu0 %v4950_v41, %s4507_s9  ;;  %2004 = vrot.lane.b32.xlu1 %v4956_v42, %s4504_s29 }
 0xb32   :  { %2008 = vrot.lane.b32.xlu1 %v4956_v42, %s4503_s28 }
 0xb98   :  { %v4968_v10 = vpop.permute.xlu0 %1999  ;;  %v4970_v7 = vpop.permute.xlu1 %1997 }
 0xb99   :  { %2162 = vrot.lane.b32.xlu0 %v4968_v10, %s4507_s9  ;;  %2086 = vrot.lane.b32.xlu1 %v4970_v7, %s4507_s9 }
 0xb9c   :  { %v4976_v5 = vpop.permute.xlu0 %2006  ;;  %v4978_v43 = vpop.permute.xlu1 %2001 }
 0xb9d   :  { %2314 = vrot.lane.b32.xlu0 %v4956_v42, %s4507_s9  ;;  %2238 = vrot.lane.b32.xlu1 %v4978_v43, %s4507_s9 }
 0xba0   :  { %v2011_v44 = vpop.permute.xlu0 %2010  ;;  %v4984_v45 = vpop.permute.xlu1 %2004 }
 0xba1   :  { %2466 = vrot.lane.b32.xlu0 %v4976_v5, %s4507_s9  ;;  %4130 = vmatpush3.xpose.msk.msra.mxu1 %vm158_vm2, %v2011_v44 }
 0xba2   :  { %2390 = vrot.lane.b32.xlu1 %v4984_v45, %s4507_s9  ;;  %4134 = vmatprep.subr.mxu1 %v4502_v14 }
 0xba4   :  { %4132 = vmatmul.mubr.msk.f32.vlgmr.msra.gmra.mrb[24].mxu1 %vm158_vm2, %v4950_v41  ;;  %v4994_v46 = vpop.permute.xlu1 %2008 }
 0xba5   :  { %4136 = vmatprep.mubr.msk.f32.mxu1 %vm4505_vm1, %v4502_v14 }
 0xba6   :  { %2542 = vrot.lane.b32.xlu1 %v4994_v46, %s4507_s9 }
 0xc0b   :  { %v2163_v47 = vpop.permute.xlu0 %2162  ;;  %v2087_v48 = vpop.permute.xlu1 %2086 }
 0xc0c   :  { %4135 = vmatpush3.xpose.msk.msra.mxu1 %vm158_vm2, %v2087_v48  ;;  %4140 = vmatpush3.xpose.msk.msra.mxu0 %vm158_vm2, %v2163_v47 }
 0xc0d   :  { %4149 = vmatprep.subr.mxu0 %v4502_v14  ;;  %4144 = vmatprep.subr.mxu1 %v4502_v14 }
 0xc0f   :  { %4142 = vmatmul.mubr.msk.f32.vlgmr.msra.gmra.mrb[18].mxu0 %vm158_vm2, %v4968_v10  ;;  %v2315_v49 = vpop.permute.xlu0 %2314  ;;  %4137 = vmatmul.mubr.msk.f32.vlgmr.msra.gmra.mrb[26].mxu1 %vm158_vm2, %v4970_v7  ;;  %v2239_v50 = vpop.permute.xlu1 %2238 }
 0xc10   :  { %4145 = vmatpush3.xpose.msk.msra.mxu1 %vm158_vm2, %v2239_v50  ;;  %4150 = vmatpush3.xpose.msk.msra.mxu0 %vm158_vm2, %v2315_v49 }
 0xc11   :  { %4146 = vmatprep.mubr.msk.f32.mxu1 %vm4505_vm1, %v4502_v14  ;;  %4151 = vmatprep.mubr.msk.f32.mxu0 %vm4505_vm1, %v4502_v14 }
 0xc12   :  { %4159 = vmatprep.subr.mxu0 %v4502_v14  ;;  %4154 = vmatprep.subr.mxu1 %v4502_v14 }
 0xc13   :  { %4152 = vmatmul.mubr.msk.f32.vlgmr.msra.gmra.mrb[20].mxu0 %vm158_vm2, %v4956_v42  ;;  %v2467_v51 = vpop.permute.xlu0 %2466  ;;  %4147 = vmatmul.mubr.msk.f32.vlgmr.msra.gmra.mrb[28].mxu1 %vm158_vm2, %v4978_v43 }
 0xc14   :  { %v2391_v53 = vpop.permute.xlu1 %2390  ;;  %4160 = vmatpush3.xpose.msk.msra.mxu0 %vm158_vm2, %v2467_v51  ;;  %4156 = vmatprep.mubr.msk.f32.mxu1 %vm4505_vm1, %v4502_v14 }
 0xc15   :  { %4155 = vmatpush3.xpose.msk.msra.mxu1 %vm158_vm2, %v2391_v53  ;;  %4161 = vmatprep.mubr.msk.f32.mxu0 %vm4505_vm1, %v4502_v14 }
 0xc16   :  { %4164 = vmatprep.subr.mxu1 %v4502_v14  ;;  %4169 = vmatprep.subr.mxu0 %v4502_v14 }
 0xc17   :  { %4162 = vmatmul.mubr.msk.f32.vlgmr.msra.gmra.mrb[22].mxu0 %vm158_vm2, %v4976_v5 }
 0xc18   :  { %4157 = vmatmul.mubr.msk.f32.vlgmr.msra.gmra.mrb[30].mxu1 %vm158_vm2, %v4984_v45  ;;  %v2543_v54 = vpop.permute.xlu1 %2542  ;;  %4171 = vmatprep.mubr.msk.f32.mxu0 %vm4505_vm1, %v4502_v14 }
 0xc19   :  { %4165 = vmatpush3.xpose.msk.msra.mxu1 %vm158_vm2, %v2543_v54  ;;  %4166 = vmatprep.mubr.msk.f32.mxu1 %vm4505_vm1, %v4502_v14 }
 0xc1a   :  { %4174 = vmatprep.subr.mxu1 %v4502_v14 }
 0xc1c   :  { %4167 = vmatmul.mubr.msk.f32.vlgmr.msra.gmra.mrb[32].mxu1 %vm158_vm2, %v4994_v46 }
 0xc1d   :  { %4176 = vmatprep.mubr.msk.f32.mxu1 %vm4505_vm1, %v4502_v14 }
 0xc77   :  { %v2082_v55 = vpop.f32.mrb[24].mxu1 }
 0xc78   :  { %v2618_v56 = vmul.f32 0.35355338, %v2082_v55  ;;  %v4133_v57 = vpop.f32.mrb[25].mxu1 }
 0xc7a   :  { %v2626_v58 = vadd.f32 %v2618_v56, %v4710_v34 }
 0xc7c   :  { %v2634_v59 = vsel %vm158_vm2, %v2626_v58, -inf }
 0xc7d   :  { %2635 = vmax.xlane.f32.xlu0 %v2634_v59 }
 0xce2   :  { %v2158_v60 = vpop.f32.mrb[26].mxu1  ;;  %v2234_v61 = vpop.f32.mrb[18].mxu0 }
 0xce3   :  { %v2619_v62 = vmul.f32 0.35355338, %v2158_v60  ;;  %v2620_v63 = vmul.f32 0.35355338, %v2234_v61  ;;  %v4138_v2 = vpop.f32.mrb[27].mxu1  ;;  %v4143_v3 = vpop.f32.mrb[19].mxu0 }
 0xce5   :  { %v2628_v4 = vadd.f32 %v2620_v63, %v4710_v34  ;;  %v2627_v6 = vadd.f32 %v2619_v62, %v4710_v34 }
 0xce6   :  { %v2310_v23 = vpop.f32.mrb[28].mxu1  ;;  %v2386_v22 = vpop.f32.mrb[20].mxu0 }
 0xce7   :  { %v2621_v24 = vmul.f32 0.35355338, %v2310_v23  ;;  %v2622_v26 = vmul.f32 0.35355338, %v2386_v22  ;;  %v4148_v27 = vpop.f32.mrb[29].mxu1  ;;  %v4153_v28 = vpop.f32.mrb[21].mxu0 }
 0xce8   :  { %v2640_v16 = vsel %vm158_vm2, %v2628_v4, -inf  ;;  %v2637_v18 = vsel %vm158_vm2, %v2627_v6, -inf }
 0xce9   :  { %2641 = vmax.xlane.f32.xlu0 %v2640_v16  ;;  %2638 = vmax.xlane.f32.xlu1 %v2637_v18  ;;  %v2630_v19 = vadd.f32 %v2622_v26, %v4717_v52  ;;  %v2629_v32 = vadd.f32 %v2621_v24, %v4710_v34 }
 0xcea   :  { %v2538_v11 = vpop.f32.mrb[22].mxu0 }
 0xceb   :  { %v2462_v38 = vpop.f32.mrb[30].mxu1  ;;  %v2624_v40 = vmul.f32 0.35355338, %v2538_v11  ;;  %v4163_v44 = vpop.f32.mrb[23].mxu0  ;;  %v2646_v47 = vsel %vm158_vm2, %v2630_v19, -inf  ;;  %v2643_v48 = vsel %vm158_vm2, %v2629_v32, -inf }
 0xcec   :  { %v2623_v49 = vmul.f32 0.35355338, %v2462_v38  ;;  %v4158_v50 = vpop.f32.mrb[31].mxu1 }
 0xced   :  { %2647 = vmax.xlane.f32.xlu1 %v2646_v47  ;;  %2644 = vmax.xlane.f32.xlu0 %v2643_v48  ;;  %v2632_v51 = vadd.f32 %v2624_v40, %v4717_v52 }
 0xcee   :  { %v2631_v53 = vadd.f32 %v2623_v49, %v4717_v52 }
 0xcef   :  { %v2614_v54 = vpop.f32.mrb[32].mxu1  ;;  %v2652_v55 = vsel %vm158_vm2, %v2632_v51, -inf }
 0xcf0   :  { %v2625_v34 = vmul.f32 0.35355338, %v2614_v54  ;;  %v4168_v56 = vpop.f32.mrb[33].mxu1  ;;  %v2649_v57 = vsel %vm158_vm2, %v2631_v53, -inf }
 0xcf1   :  { %2653 = vmax.xlane.f32.xlu1 %v2652_v55  ;;  %2650 = vmax.xlane.f32.xlu0 %v2649_v57 }
 0xcf2   :  { %v2633_v59 = vadd.f32 %v2625_v34, %v4717_v52 }
 0xcf4   :  { %v2655_v60 = vsel %vm158_vm2, %v2633_v59, -inf }
 0xcf5   :  { %2656 = vmax.xlane.f32.xlu0 %v2655_v60 }
 0xd02   :  { %2759 = vrot.lane.b32.xlu1 %v4950_v41, %s4508_s1 }
 0xd06   :  { %2910 = vrot.lane.b32.xlu1 %v4968_v10, %s4508_s1 }
 0xd0a   :  { %2985 = vrot.lane.b32.xlu1 %v4978_v43, %s4508_s1  ;;  %v2636_v52 = vpop.xlane.xlu0 %2635 }
 0xd0b   :  { %2835 = vrot.lane.b32.xlu0 %v4970_v7, %s4508_s1  ;;  %v2658_v61 = vsub.f32 %v2626_v58, %v2636_v52 }
 0xd0d   :  { %v2666_v62 = vmul.f32 1.442695, %v2658_v61 }
 0xd0e   :  { %3135 = vrot.lane.b32.xlu1 %v4984_v45, %s4508_s1 }
 0xd0f   :  { %3060 = vrot.lane.b32.xlu0 %v4956_v42, %s4508_s1  ;;  %4387 = vpow2.f32 %v2666_v62 }
 0xd19   :  { %v5070_v41 = vpop.eup %4387 }
 0xd1a   :  { %v2682_v10 = vsel %vm158_vm2, %v5070_v41, 0.0 }
 0xd32   :  { %2683 = vadd.xlane.f32.xlu1 %v2682_v10 }
 0xd76   :  { %v2642_v43 = vpop.xlane.xlu0 %2641  ;;  %v2639_v63 = vpop.xlane.xlu1 %2638 }
 0xd77   :  { %v2660_v2 = vsub.f32 %v2628_v4, %v2642_v43  ;;  %v2659_v7 = vsub.f32 %v2627_v6, %v2639_v63 }
 0xd79   :  { %v2670_v3 = vmul.f32 1.442695, %v2660_v2  ;;  %v2668_v23 = vmul.f32 1.442695, %v2659_v7 }
 0xd7a   :  { %v2645_v45 = vpop.xlane.xlu0 %2644  ;;  %v2648_v22 = vpop.xlane.xlu1 %2647 }
 0xd7b   :  { %4389 = vpow2.f32 %v2670_v3  ;;  %v2661_v42 = vsub.f32 %v2629_v32, %v2645_v45  ;;  %v2662_v24 = vsub.f32 %v2630_v19, %v2648_v22 }
 0xd7c   :  { %4391 = vpow2.f32 %v2668_v23 }
 0xd7d   :  { %v2672_v58 = vmul.f32 1.442695, %v2661_v42  ;;  %v2674_v26 = vmul.f32 1.442695, %v2662_v24 }
 0xd7e   :  { %v2651_v27 = vpop.xlane.xlu0 %2650  ;;  %v2654_v28 = vpop.xlane.xlu1 %2653 }
 0xd7f   :  { %4393 = vpow2.f32 %v2672_v58  ;;  %v2663_v16 = vsub.f32 %v2631_v53, %v2651_v27  ;;  %v2664_v18 = vsub.f32 %v2632_v51, %v2654_v28 }
 0xd80   :  { %4395 = vpow2.f32 %v2674_v26 }
 0xd81   :  { %v2676_v11 = vmul.f32 1.442695, %v2663_v16  ;;  %v2678_v38 = vmul.f32 1.442695, %v2664_v18 }
 0xd82   :  { %v2657_v4 = vpop.xlane.xlu0 %2656  ;;  %v2760_v6 = vpop.permute.xlu1 %2759 }
 0xd83   :  { %4397 = vpow2.f32 %v2676_v11  ;;  %v2665_v40 = vsub.f32 %v2633_v59, %v2657_v4  ;;  %4170 = vmatpush3.msra.mxu0 %v2760_v6 }
 0xd84   :  { %4399 = vpow2.f32 %v2678_v38  ;;  %4179 = vmatprep.subr.mxu0 %v4502_v14 }
 0xd85   :  { %v4390_v19 = vpop.eup %4389  ;;  %v2680_v32 = vmul.f32 1.442695, %v2665_v40 }
 0xd86   :  { %v4392_v44 = vpop.eup %4391  ;;  %v2836_v47 = vpop.permute.xlu0 %2835  ;;  %v2688_v48 = vsel %vm158_vm2, %v4390_v19, 0.0 }
 0xd87   :  { %4401 = vpow2.f32 %v2680_v32  ;;  %2689 = vadd.xlane.f32.xlu1 %v2688_v48  ;;  %4175 = vmatpush3.msra.mxu1 %v2836_v47  ;;  %v2685_v49 = vsel %vm158_vm2, %v4392_v44, 0.0  ;;  %v2911_v52 = vpop.permute.xlu1 %2910  ;;  %v3844_v48 = vld [vmem:[%s5322_s3 + $0x20] sm:$0xff] }
 0xd88   :  { %2686 = vadd.xlane.f32.xlu0 %v2685_v49  ;;  %4184 = vmatprep.subr.mxu1 %v4502_v14  ;;  %v3845_v49 = vld [vmem:[%s5322_s3 + $0x28] sm:$0xff] }
 0xd89   :  { %v4394_v50 = vpop.eup %4393 }
 0xd8a   :  { %v4396_v51 = vpop.eup %4395  ;;  %v2691_v53 = vsel %vm158_vm2, %v4394_v50, 0.0 }
 0xd8b   :  { %v2694_v54 = vsel %vm158_vm2, %v4396_v51, 0.0  ;;  %v2986_v61 = vpop.permute.xlu1 %2985 }
 0xd8c   :  { %2692 = vadd.xlane.f32.xlu0 %v2691_v53  ;;  %2695 = vadd.xlane.f32.xlu1 %v2694_v54 }
 0xd8d   :  { %v4398_v55 = vpop.eup %4397 }
 0xd8e   :  { %v4400_v34 = vpop.eup %4399  ;;  %v2697_v56 = vsel %vm158_vm2, %v4398_v55, 0.0 }
 0xd8f   :  { %v2700_v57 = vsel %vm158_vm2, %v4400_v34, 0.0  ;;  %v3136_v62 = vpop.permute.xlu1 %3135 }
 0xd90   :  { %2698 = vadd.xlane.f32.xlu0 %v2697_v56  ;;  %2701 = vadd.xlane.f32.xlu1 %v2700_v57 }
 0xd91   :  { %v5082_v59 = vpop.eup %4401 }
 0xd92   :  { %v2703_v60 = vsel %vm158_vm2, %v5082_v59, 0.0 }
 0xd94   :  { %2704 = vadd.xlane.f32.xlu0 %v2703_v60 }
 0xda1   :  { %3285 = vrot.lane.b32.xlu1 %v4994_v46, %s4508_s1  ;;  %v3061_v46 = vpop.permute.xlu0 %3060 }
 0xdaa   :  { %3210 = vrot.lane.b32.xlu0 %v4976_v5, %s4508_s1 }
 0xdbf   :  { %v2684_v10 = vpop.xlane.xlu1 %2683 }
 0xdc0   :  { %4403 = vrcp.f32 %v2684_v10 }
 0xdca   :  { %v4404_v43 = vpop.eup %4403 }
 0xdcb   :  { %v5091_v63 = vmul.f32 %v4404_v43, %v5070_v41 }
 0xdcd   :  { %4172 = vmatmul.mubr.msk.f32.vlgmr.msra.gmra.mrb[24].mxu0 %vm158_vm2, %v5091_v63 }
 0xdce   :  { %4180 = vmatpush3.msra.mxu0 %v2911_v52  ;;  %4181 = vmatprep.mubr.msk.f32.mxu0 %vm4505_vm1, %v4502_v14 }
 0xdcf   :  { %4189 = vmatprep.subr.mxu0 %v4502_v14 }
 0xe14   :  { %v2690_v5 = vpop.xlane.xlu1 %2689 }
 0xe15   :  { %v2687_v2 = vpop.xlane.xlu0 %2686  ;;  %4405 = vrcp.f32 %v2690_v5 }
 0xe16   :  { %4407 = vrcp.f32 %v2687_v2 }
 0xe19   :  { %v2693_v7 = vpop.xlane.xlu0 %2692  ;;  %v2696_v3 = vpop.xlane.xlu1 %2695 }
 0xe1a   :  { %4409 = vrcp.f32 %v2693_v7 }
 0xe1b   :  { %4411 = vrcp.f32 %v2696_v3 }
 0xe1d   :  { %v2699_v41 = vpop.xlane.xlu0 %2698  ;;  %v2702_v23 = vpop.xlane.xlu1 %2701 }
 0xe1e   :  { %4413 = vrcp.f32 %v2699_v41 }
 0xe1f   :  { %v4406_v45 = vpop.eup %4405  ;;  %4415 = vrcp.f32 %v2702_v23 }
 0xe20   :  { %v4408_v22 = vpop.eup %4407  ;;  %v5098_v42 = vmul.f32 %v4406_v45, %v4390_v19 }
 0xe21   :  { %v5100_v24 = vmul.f32 %v4408_v22, %v4392_v44  ;;  %v2705_v58 = vpop.xlane.xlu0 %2704  ;;  %v3286_v40 = vpop.permute.xlu1 %3285 }
 0xe22   :  { %4417 = vrcp.f32 %v2705_v58  ;;  %4182 = vmatmul.mubr.msk.f32.vlgmr.msra.gmra.mrb[26].mxu0 %vm158_vm2, %v5098_v42 }
 0xe23   :  { %4177 = vmatmul.mubr.msk.f32.vlgmr.msra.gmra.mrb[34].mxu1 %vm158_vm2, %v5100_v24  ;;  %4190 = vmatpush3.msra.mxu0 %v3061_v46 }
 0xe24   :  { %v4410_v26 = vpop.eup %4409  ;;  %4185 = vmatpush3.msra.mxu1 %v2986_v61  ;;  %4186 = vmatprep.mubr.msk.f32.mxu1 %vm4505_vm1, %v4502_v14 }
 0xe25   :  { %v4412_v27 = vpop.eup %4411  ;;  %v5108_v28 = vmul.f32 %v4410_v26, %v4394_v50  ;;  %4191 = vmatprep.mubr.msk.f32.mxu0 %vm4505_vm1, %v4502_v14  ;;  %4194 = vmatprep.subr.mxu1 %v4502_v14  ;;  %v3211_v18 = vpop.permute.xlu0 %3210  ;;  %v4298_v50 = vpack.c.bf16 %v3845_v49, %v3844_v48 }
 0xe26   :  { %v5113_v16 = vmul.f32 %v4412_v27, %v4396_v51  ;;  %4199 = vmatprep.subr.mxu0 %v4502_v14  ;;  %v3846_v51 = vld [vmem:[%s5322_s3 + $0x30] sm:$0xff] }
 0xe27   :  { %4187 = vmatmul.mubr.msk.f32.vlgmr.msra.gmra.mrb[36].mxu1 %vm158_vm2, %v5108_v28 }
 0xe28   :  { %v4414_v11 = vpop.eup %4413  ;;  %4192 = vmatmul.mubr.msk.f32.vlgmr.msra.gmra.mrb[28].mxu0 %vm158_vm2, %v5113_v16  ;;  %4195 = vmatpush3.msra.mxu1 %v3136_v62 }
 0xe29   :  { %v4416_v38 = vpop.eup %4415  ;;  %v5120_v4 = vmul.f32 %v4414_v11, %v4398_v55  ;;  %4200 = vmatpush3.msra.mxu0 %v3211_v18  ;;  %4196 = vmatprep.mubr.msk.f32.mxu1 %vm4505_vm1, %v4502_v14 }
 0xe2a   :  { %v5124_v6 = vmul.f32 %v4416_v38, %v4400_v34  ;;  %4201 = vmatprep.mubr.msk.f32.mxu0 %vm4505_vm1, %v4502_v14  ;;  %4204 = vmatprep.subr.mxu1 %v4502_v14  ;;  %v3398_v38 = vrot.slane %v4946_v36, %v1556_v13 }
 0xe2b   :  { %4197 = vmatmul.mubr.msk.f32.vlgmr.msra.gmra.mrb[38].mxu1 %vm158_vm2, %v5120_v4  ;;  %4299 = vmatprep.subr.bf16.mxu0 %v4298_v50 }
 0xe2c   :  { %v4418_v19 = vpop.eup %4417  ;;  %4202 = vmatmul.mubr.msk.f32.vlgmr.msra.gmra.mrb[30].mxu0 %vm158_vm2, %v5124_v6  ;;  %4205 = vmatpush3.msra.mxu1 %v3286_v40 }
 0xe2d   :  { %v5134_v32 = vmul.f32 %v4418_v19, %v5082_v59  ;;  %4206 = vmatprep.mubr.msk.f32.mxu1 %vm4505_vm1, %v4502_v14  ;;  %v3847_v14 = vld [vmem:[%s5322_s3 + $0x38] sm:$0xff]  ;;  %4301 = vmatpush3.bf16.msra.mxu0 %v4298_v50 }
 0xe2e   :  { %v4302_v53 = vpack.c.bf16 %v3847_v14, %v3846_v51 }
 0xe2f   :  { %4207 = vmatmul.mubr.msk.f32.vlgmr.msra.gmra.mrb[40].mxu1 %vm158_vm2, %v5134_v32 }
 0xe30   :  { %4303 = vmatprep.subr.bf16.mxu0 %v4302_v53 }
 0xe31   :  { %4305 = vmatpush3.bf16.msra.mxu0 %v4302_v53 }
 0xea0   :  { %v2831_v44 = vpop.f32.mrb[24].mxu0 }
 0xea1   :  { %v4173_v47 = vpop.f32.mrb[25].mxu0 }
 0xef5   :  { %v2981_v54 = vpop.f32.mrb[26].mxu0 }
 0xef6   :  { %v2906_v55 = vpop.f32.mrb[34].mxu1  ;;  %3365 = vrot.lane.b32.xlu1 %v2981_v54, %s4509_s22  ;;  %v4183_v34 = vpop.f32.mrb[27].mxu0 }
 0xef7   :  { %3361 = vrot.lane.b32.xlu0 %v2906_v55, %s4501_s16  ;;  %v4178_v56 = vpop.f32.mrb[35].mxu1 }
 0xefa   :  { %v3056_v57 = vpop.f32.mrb[36].mxu1 }
 0xefb   :  { %v3131_v59 = vpop.f32.mrb[28].mxu0  ;;  %v4188_v60 = vpop.f32.mrb[37].mxu1  ;;  %3369 = vrot.lane.b32.xlu1 %v3056_v57, %s4510_s23 }
 0xefc   :  { %v4193_v52 = vpop.f32.mrb[29].mxu0  ;;  %v3851_v60 = vld [vmem:[%s5323_s4 + $0x28] sm:$0xff] }
 0xefe   :  { %v3206_v61 = vpop.f32.mrb[38].mxu1 }
 0xeff   :  { %v3281_v62 = vpop.f32.mrb[30].mxu0  ;;  %3376 = vrot.lane.b32.xlu0 %v3206_v61, %s4501_s16  ;;  %v4198_v10 = vpop.f32.mrb[39].mxu1  ;;  %v3852_v61 = vld [vmem:[%s5323_s4 + $0x30] sm:$0xff] }
 0xf00   :  { %v4203_v43 = vpop.f32.mrb[31].mxu0 }
 0xf01   :  { %v3856_v43 = vld [vmem:[%s5324_s5 + $0x40] sm:$0xff] }
 0xf02   :  { %v3356_v46 = vpop.f32.mrb[40].mxu1 }
 0xf03   :  { %3380 = vrot.lane.b32.xlu0 %v3281_v62, %s4509_s22  ;;  %3384 = vrot.lane.b32.xlu1 %v3356_v46, %s4510_s23  ;;  %v4208_v5 = vpop.f32.mrb[41].mxu1  ;;  %v3853_v62 = vld [vmem:[%s5323_s4 + $0x38] sm:$0xff]  ;;  %v3857_v46 = vld [vmem:[%s5324_s5 + $0x48] sm:$0xff] }
 0xf04   :  { %v4310_v10 = vpack.c.bf16 %v3853_v62, %v3852_v61  ;;  %v3858_v5 = vld [vmem:[%s5324_s5 + $0x50] sm:$0xff] }
 0xf68   :  { %v3366_v2 = vpop.permute.xlu1 %3365 }
 0xf69   :  { %v3362_v7 = vpop.permute.xlu0 %3361 }
 0xf6a   :  { %v3372_v3 = vsel %vm158_vm2, %v2831_v44, %v3362_v7  ;;  %v3859_v7 = vld [vmem:[%s5324_s5 + $0x58] sm:$0xff] }
 0xf6b   :  { %v3373_v41 = vsel %vm906_vm3, %v3372_v3, %v3366_v2  ;;  %v4314_v2 = vpack.c.bf16 %v3857_v46, %v3856_v43  ;;  %v4318_v3 = vpack.c.bf16 %v3859_v7, %v3858_v5 }
 0xf6d   :  { %v3370_v23 = vpop.permute.xlu1 %3369  ;;  %4315 = vmatprep.subr.bf16.mxu0 %v4314_v2 }
 0xf6e   :  { %v3374_v45 = vsel %vm908_vm4, %v3373_v41, %v3370_v23  ;;  %v3860_v41 = vld [vmem:[%s5324_s5 + $0x60] sm:$0xff]  ;;  %v3861_v23 = vld [vmem:[%s5324_s5 + $0x68] sm:$0xff] }
 0xf6f   :  { %4217 = vmatprep.mubr.msk.f32.mxu0 %vm60_vm0, %v3374_v45  ;;  %v4322_v45 = vpack.c.bf16 %v3861_v23, %v3860_v41 }
 0xf71   :  { %v3377_v22 = vpop.permute.xlu0 %3376 }
 0xf72   :  { %v3387_v58 = vsel %vm158_vm2, %v3131_v59, %v3377_v22 }
 0xf75   :  { %v3381_v26 = vpop.permute.xlu0 %3380  ;;  %v3385_v27 = vpop.permute.xlu1 %3384 }
 0xf76   :  { %v3388_v18 = vsel %vm906_vm3, %v3387_v58, %v3381_v26 }
 0xf77   :  { %v3389_v11 = vsel %vm908_vm4, %v3388_v18, %v3385_v27 }
 0xf78   :  { %4218 = vmatmul.mubr.msk.f32.vlgmr.msra.gmra.mrb[32].mxu0 %vm60_vm0, %v3389_v11 }
 0xf79   :  { %4317 = vmatpush3.bf16.msra.mxu0 %v4314_v2 }
 0xf7a   :  { %4319 = vmatprep.subr.bf16.mxu0 %v4318_v3 }
 0xf7d   :  { %4321 = vmatpush3.bf16.msra.mxu0 %v4318_v3 }
 0xf7e   :  { %4323 = vmatprep.subr.bf16.mxu0 %v4322_v45 }
 0xf81   :  { %4325 = vmatpush3.bf16.msra.mxu0 %v4322_v45 }
0x104b   :  { %v4219_v40 = vpop.f32.mrb[32].mxu0 }
0x104c   :  { %v3477_v19 = vadd.f32 %v4219_v40, %v3398_v38  ;;  %v3471_v44 = vpop.f32.mrb[33].mxu0 }
0x104d   :  { %v3472_v47 = vadd.f32 %v3471_v44, %v3398_v38  ;;  %v3511_v38 = vrot.slane %v4946_v36, %v1670_v0  ;;  %v3517_v44 = vrot.slane %v4946_v36, %v1676_v1  ;;  %v3862_v0 = vld [vmem:[%s5324_s5 + $0x70] sm:$0xff]  ;;  %v3528_v1 = vrot.slane %v4946_v36, %v1686_v20 }
0x104e   :  { %v3481_v48 = vadd.f32 %v3477_v19, %v4935_v17 }
0x104f   :  { %v3480_v49 = vadd.f32 %v3472_v47, %v4933_v21  ;;  %v3850_v21 = vld [vmem:[%s5323_s4 + $0x20] sm:$0xff] }
0x1050   :  { %v3485_v50 = vsel %vm60_vm0, %v3481_v48, 0.0  ;;  %v4306_v52 = vpack.c.bf16 %v3851_v60, %v3850_v21 }
0x1051   :  { %3486 = vadd.xlane.f32.xlu1 %v3485_v50  ;;  %v3482_v51 = vsel %vm60_vm0, %v3480_v49, 0.0 }
0x1052   :  { %3483 = vadd.xlane.f32.xlu0 %v3482_v51  ;;  %4307 = vmatprep.subr.bf16.mxu1 %v4306_v52 }
0x1053   :  { %4309 = vmatpush3.bf16.msra.mxu1 %v4306_v52 }
0x1054   :  { %4311 = vmatprep.subr.bf16.mxu1 %v4310_v10 }
0x1057   :  { %4313 = vmatpush3.bf16.msra.mxu1 %v4310_v10 }
0x10de   :  { %v3487_v14 = vpop.xlane.xlu1 %3486 }
0x10df   :  { %v3489_v53 = vmul.f32 0.03125, %v3487_v14  ;;  %v3484_v54 = vpop.xlane.xlu0 %3483 }
0x10e0   :  { %v3488_v55 = vmul.f32 0.03125, %v3484_v54 }
0x10e1   :  { %v3491_v34 = vsub.f32 %v3481_v48, %v3489_v53  ;;  %v3863_v53 = vld [vmem:[%s5324_s5 + $0x78] sm:$0xff]  ;;  %s4511_s5 = smov 32  }
0x10e2   :  { %v3490_v13 = vsub.f32 %v3480_v49, %v3488_v55  ;;  %v4326_v54 = vpack.c.bf16 %v3863_v53, %v3862_v0 }
0x10e3   :  { %v3493_v59 = vmul.f32 %v3491_v34, %v3491_v34 }
0x10e4   :  { %v3492_v56 = vmul.f32 %v3490_v13, %v3490_v13  ;;  %4327 = vmatprep.subr.bf16.mxu0 %v4326_v54 }
0x10e5   :  { %v3497_v17 = vsel %vm60_vm0, %v3493_v59, 0.0  ;;  %4329 = vmatpush3.bf16.msra.mxu0 %v4326_v54 }
0x10e6   :  { %v3494_v57 = vsel %vm60_vm0, %v3492_v56, 0.0 }
0x10e7   :  { %3495 = vadd.xlane.f32.xlu0 %v3494_v57 }
0x10eb   :  { %3498 = vadd.xlane.f32.xlu0 %v3497_v17  ;;  %v3624_v17 = vrot.slane %v4946_v36, %v1781_v39 }
0x1174   :  { %v3496_v22 = vpop.xlane.xlu0 %3495 }
0x1175   :  { %v3500_v58 = vmul.f32 0.03125, %v3496_v22 }
0x1177   :  { %v3502_v26 = vadd.f32 1e-06, %v3500_v58 }
0x1178   :  { %v3499_v27 = vpop.xlane.xlu0 %3498 }
0x1179   :  { %4419 = vrsqrt.f32 %v3502_v26  ;;  %v3501_v18 = vmul.f32 0.03125, %v3499_v27 }
0x117b   :  { %v3503_v11 = vadd.f32 1e-06, %v3501_v18 }
0x117d   :  { %4421 = vrsqrt.f32 %v3503_v11 }
0x1183   :  { %v4420_v40 = vpop.eup %4419 }
0x1184   :  { %v3506_v19 = vmul.f32 %v4420_v40, %v3490_v13 }
0x1186   :  { %v3512_v47 = vmul.f32 %v3511_v38, %v3506_v19 }
0x1187   :  { %v4422_v48 = vpop.eup %4421 }
0x1188   :  { %v3507_v49 = vmul.f32 %v4422_v48, %v3491_v34  ;;  %v3518_v50 = vadd.f32 %v3517_v44, %v3512_v47 }
0x118a   :  { %v3513_v51 = vmul.f32 %v3511_v38, %v3507_v49  ;;  %4228 = vmatprep.mubr.msk.f32.mxu1 %vm60_vm0, %v3518_v50 }
0x118c   :  { %v3519_v14 = vadd.f32 %v3517_v44, %v3513_v51 }
0x118e   :  { %4229 = vmatmul.mubr.msk.f32.vlgmr.msra.gmra.mrb[42].mxu1 %vm60_vm0, %v3519_v14 }
0x1261   :  { %v4230_v55 = vpop.f32.mrb[42].mxu1 }
0x1262   :  { %v3607_v34 = vadd.f32 %v4230_v55, %v3528_v1  ;;  %v3601_v13 = vpop.f32.mrb[43].mxu1 }
0x1263   :  { %v3602_v56 = vadd.f32 %v3601_v13, %v3528_v1 }
0x1264   :  { %v3611_v59 = vmax.f32 %v3607_v34, 0.0 }
0x1265   :  { %v3610_v57 = vmax.f32 %v3602_v56, 0.0 }
0x1267   :  { %4247 = vmatprep.mubr.msk.f32.mxu0 %vm917_vm5, %v3610_v57 }
0x1268   :  { %4248 = vmatmul.mubr.msk.f32.vlgmr.msra.gmra.mrb[34].mxu0 %vm917_vm5, %v3611_v59 }
0x133b   :  { %v4249_v21 = vpop.f32.mrb[34].mxu0 }
0x133c   :  { %v3703_v60 = vadd.f32 %v4249_v21, %v3624_v17  ;;  %v3697_v52 = vpop.f32.mrb[35].mxu0 }
0x133d   :  { %v3698_v61 = vadd.f32 %v3697_v52, %v3624_v17 }
0x133e   :  { %v3707_v62 = vadd.f32 %v3703_v60, %v3519_v14 }
0x133f   :  { %v3706_v20 = vadd.f32 %v3698_v61, %v3518_v50 }
0x1340   :  { %v3711_v10 = vsel %vm60_vm0, %v3707_v62, 0.0 }
0x1341   :  { %3712 = vadd.xlane.f32.xlu0 %v3711_v10  ;;  %v3708_v43 = vsel %vm60_vm0, %v3706_v20, 0.0 }
0x1342   :  { %3709 = vadd.xlane.f32.xlu1 %v3708_v43 }
0x1353   :  { %878 = vrot.lane.b32.xlu1 %v4771_v25, %s4501_s16 }
0x1357   :  { %2723 = vrot.lane.b32.xlu0 %v5100_v24, %s4501_s16  ;;  %882 = vrot.lane.b32.xlu1 %v4777_v29, %s4509_s22 }
0x135b   :  { %886 = vrot.lane.b32.xlu0 %v4787_v31, %s4510_s23  ;;  %2727 = vrot.lane.b32.xlu1 %v5098_v42, %s4509_s22 }
0x135f   :  { %890 = vrot.lane.b32.xlu0 %v4784_v30, %s4511_s5  ;;  %2731 = vrot.lane.b32.xlu1 %v5108_v28, %s4510_s23 }
0x1363   :  { %894 = vrot.lane.b32.xlu0 %v4797_v35, %s4512_s11  ;;  %2735 = vrot.lane.b32.xlu1 %v5113_v16, %s4511_s5 }
0x1367   :  { %2739 = vrot.lane.b32.xlu1 %v5120_v4, %s4512_s11 }
0x136b   :  { %2743 = vrot.lane.b32.xlu1 %v5124_v6, %s4513_s12 }
0x13ce   :  { %v3713_v25 = vpop.xlane.xlu0 %3712 }
0x13cf   :  { %v3715_v29 = vmul.f32 0.03125, %v3713_v25  ;;  %v3710_v31 = vpop.xlane.xlu1 %3709 }
0x13d0   :  { %v3714_v39 = vmul.f32 0.03125, %v3710_v31 }
0x13d1   :  { %v5246_v42 = vsub.f32 %v3707_v62, %v3715_v29 }
0x13d2   :  { %v5248_v30 = vsub.f32 %v3706_v20, %v3714_v39  ;;  %v2724_v5 = vpop.permute.xlu0 %2723 }
0x13d3   :  { %v3719_v24 = vmul.f32 %v5246_v42, %v5246_v42  ;;  %v879_v4 = vpop.permute.xlu1 %878 }
0x13d4   :  { %v3718_v35 = vmul.f32 %v5248_v30, %v5248_v30  ;;  %v905_v58 = vsel %vm158_vm2, %v4764_v8, %v879_v4 }
0x13d5   :  { %v3723_v28 = vsel %vm60_vm0, %v3719_v24, 0.0 }
0x13d6   :  { %3724 = vadd.xlane.f32.xlu0 %v3723_v28  ;;  %v3720_v16 = vsel %vm60_vm0, %v3718_v35, 0.0  ;;  %v887_v7 = vpop.permute.xlu0 %886 }
0x13d7   :  { %3721 = vadd.xlane.f32.xlu1 %v3720_v16  ;;  %v883_v6 = vpop.permute.xlu1 %882 }
0x13da   :  { %v891_v41 = vpop.permute.xlu0 %890 }
0x13db   :  { %v2728_v46 = vpop.permute.xlu1 %2727 }
0x13de   :  { %v895_v45 = vpop.permute.xlu0 %894 }
0x13df   :  { %v2732_v2 = vpop.permute.xlu1 %2731 }
0x13e3   :  { %v2736_v3 = vpop.permute.xlu1 %2735 }
0x13e7   :  { %v2740_v23 = vpop.permute.xlu1 %2739 }
0x13e8   :  { %2747 = vrot.lane.b32.xlu1 %v5134_v32, %s4503_s28  ;;  %v907_v32 = vsel %vm906_vm3, %v905_v58, %v883_v6 }
0x13e9   :  { %v909_v40 = vsel %vm908_vm4, %v907_v32, %v887_v7 }
0x13ea   :  { %v910_v50 = vsel %vm60_vm0, %v909_v40, %v891_v41 }
0x13eb   :  { %v2744_v22 = vpop.permute.xlu1 %2743  ;;  %v912_v14 = vsel %vm911_vm6, %v910_v50, %v895_v45 }
0x13ec   :  { %898 = vrot.lane.b32.xlu0 %v4793_v33, %s4513_s12  ;;  %v2750_v33 = vsel %vm158_vm2, %v5091_v63, %v2724_v5 }
0x13ed   :  { %v2751_v26 = vsel %vm906_vm3, %v2750_v33, %v2728_v46 }
0x13ee   :  { %v2752_v11 = vsel %vm908_vm4, %v2751_v26, %v2732_v2 }
0x13ef   :  { %v2753_v19 = vsel %vm60_vm0, %v2752_v11, %v2736_v3 }
0x13f0   :  { %902 = vrot.lane.b32.xlu0 %v4809_v37, %s4503_s28  ;;  %v2754_v63 = vsel %vm911_vm6, %v2753_v19, %v2740_v23  ;;  %s4514_s28 = smov [#allocation6]  }
0x13f1   :  { %v2755_v48 = vsel %vm913_vm7, %v2754_v63, %v2744_v22  ;;  %s3765_s22 = sshll.u32 %s4514_s28, 4  ;;  %s3766_s22 = int_to_ptr.vmem [resolvable:$true] %s3765_s22 }
0x13f2   :  { %s4449_s23 = scalar_lea.vmem %s3766_s22, 256  ;;  %p4454_p9 = scmp.lt.s32.totalorder %s3766_s22, %s3766_s22 }
0x13f3   :  { %p4450_p8 = scmp.ne.s32.totalorder %s3766_s22, %s4449_s23  ;;  %p4455_p10 = scmp.lt.s32.totalorder %s4449_s23, %s4449_s23 }
0x13f5   :  { %p4456_p11 = por %p4455_p10, %p4454_p9 }
0x13f7   :  { %p4457_p12 = pnand %p4456_p11, %p4450_p8 }
0x1463   :  { %v3725_v37 = vpop.xlane.xlu0 %3724 }
0x1464   :  { %v3727_v27 = vmul.f32 0.03125, %v3725_v37  ;;  %v3722_v18 = vpop.xlane.xlu1 %3721 }
0x1465   :  { %v3726_v38 = vmul.f32 0.03125, %v3722_v18 }
0x1466   :  { %v3729_v8 = vadd.f32 1e-06, %v3727_v27 }
0x1467   :  { %v3728_v44 = vadd.f32 1e-06, %v3726_v38  ;;  %v899_v47 = vpop.permute.xlu0 %898 }
0x1468   :  { %4423 = vrsqrt.f32 %v3729_v8  ;;  %v2748_v49 = vpop.permute.xlu1 %2747  ;;  %v914_v0 = vsel %vm913_vm7, %v912_v14, %v899_v47 }
0x1469   :  { %4425 = vrsqrt.f32 %v3728_v44  ;;  %v2756_v51 = vsel %vm915_vm8, %v2755_v48, %v2748_v49 }
0x146a   :  { %2758 = vst.msk [vmem:[#allocation6 + $0x8] sm:$0xff] %vm917_vm5, %v2756_v51 }
0x146b   :  { %v903_v53 = vpop.permute.xlu0 %902 }
0x146c   :  { %v916_v54 = vsel %vm915_vm8, %v914_v0, %v903_v53 }
0x146d   :  { %918 = vst.msk [vmem:[#allocation6] sm:$0xff] %vm917_vm5, %v916_v54 }
0x146e   :  { %4460 = shalt.err (!%p4457_p12)
}
0x146f   :  { %s4461_s17 = scalar_lea.hbm %s5327_s8, 256 }
0x1470   :  { %p4462_p13 = scmp.ne.s32.totalorder %s5327_s8, %s4461_s17  ;;  %p4465_p0 = scmp.lt.u32.totalorder %s4461_s17, %s5327_s8 }
0x1472   :  { %p4467_p1 = pnand %p4465_p0, %p4462_p13 }
0x1474   :  { %4470 = shalt.err (!%p4467_p1)
}
0x1475   :  { %3771 = dma.vmem_to_hbm [thread:$0]  %s3766_s22, 256, %s5327_s8, [#allocation7], %s4500_s15, %s4500_s15, %s4501_s16   ;;  %v3737_v1 = vrot.slane %v4946_v36, %v1894_v12  ;;  %v4424_v55 = vpop.eup %4423  ;;  %v3743_v56 = vrot.slane %v4946_v36, %v1900_v15 }
0x1476   :  { %v4426_v34 = vpop.eup %4425  ;;  %v3733_v13 = vmul.f32 %v4424_v55, %v5246_v42  ;;  %s4515_s2 = smov [#allocation5]  }
0x1477   :  { %v3732_v57 = vmul.f32 %v4426_v34, %v5248_v30  ;;  %s3753_s26 = sshll.u32 %s4515_s2, 4  ;;  %s3754_s26 = int_to_ptr.vmem [resolvable:$true] %s3753_s26 }
0x1478   :  { %v3739_v59 = vmul.f32 %v3737_v1, %v3733_v13  ;;  %s4471_s8 = scalar_lea.vmem %s3754_s26, 256  ;;  %p4476_p3 = scmp.lt.s32.totalorder %s3754_s26, %s3754_s26 }
0x1479   :  { %v3738_v17 = vmul.f32 %v3737_v1, %v3732_v57  ;;  %p4472_p2 = scmp.ne.s32.totalorder %s3754_s26, %s4471_s8  ;;  %p4477_p4 = scmp.lt.s32.totalorder %s4471_s8, %s4471_s8 }
0x147a   :  { %v3745_v21 = vadd.f32 %v3743_v56, %v3739_v59 }
0x147b   :  { %v3744_v60 = vadd.f32 %v3743_v56, %v3738_v17  ;;  %p4478_p5 = por %p4477_p4, %p4476_p3 }
0x147c   :  { %3747 = vst.msk [vmem:[#allocation5 + $0x8] sm:$0xff] %vm60_vm0, %v3745_v21 }
0x147d   :  { %3746 = vst.msk [vmem:[#allocation5] sm:$0xff] %vm60_vm0, %v3744_v60  ;;  %p4479_p6 = pnand %p4478_p5, %p4472_p2 }
0x147f   :  { %4482 = shalt.err (!%p4479_p6)
}
0x1480   :  { %s4483_s4 = scalar_lea.hbm %s5326_s7, 256 }
0x1481   :  { %p4484_p7 = scmp.ne.s32.totalorder %s5326_s7, %s4483_s4  ;;  %p4487_p8 = scmp.lt.u32.totalorder %s4483_s4, %s5326_s7 }
0x1483   :  { %p4489_p9 = pnand %p4487_p8, %p4484_p7 }
0x1485   :  { %4492 = shalt.err (!%p4489_p9)
}
0x1486   :  { %3759 = dma.vmem_to_hbm [thread:$0]  %s3754_s26, 256, %s5326_s7, [#allocation4], %s4500_s15, %s4500_s15, %s4501_s16  }
0x1487   :  { %4495 = dma.done.wait [#allocation4], 256  }
0x1488   :  { %4496 = vsyncadd [#allocation4], 4294967040 }
0x1489   :  { %4497 = dma.done.wait [#allocation7], 256  }
0x148a   :  { %4498 = vsyncadd [#allocation7], 4294967040 }
0x148b   :  { %3778 = vsyncpa [#allocation3], 1 }
0x148c   :  { %3779 = vsyncpa [#allocation4], 1 }
0x148d   :  { %3780 = vsyncpa [#allocation7], 1 }

</bundles_post_ra>
